<compile_context>
chip_gen: v6e
topology: v6e:2x2x1
jax: 0.10.0
libtpu: 0.0.40
codegen_flags: <defaults>
</compile_context>

<pallas_src>
import math
import functools

import numpy as np
import jax
import jax.numpy as jnp
from jax.experimental import pallas as pl
from jax.experimental.pallas import tpu as pltpu


def mixtral_block_kernel(
    x_ref, scale_ref, cosf_ref, sinf_ref,
    wq_ref, bq_ref, wk_ref, bk_ref, wv_ref, bv_ref, wo_ref, bo_ref,
    wr_ref, br_ref, w1_ref, b1_ref, w2_ref, b2_ref,
    out_ref, xn2_ref, gate_ref,
    *, num_heads, head_size, num_experts, top_k, eps):
  T, D = x_ref.shape
  e = pl.program_id(1)

  def rmsnorm(v):                                       # f32 in / f32 out
    ms = jnp.mean(v * v, axis=-1, keepdims=True)
    return v * jax.lax.rsqrt(ms + eps) * scale_ref[...]

  def linear_bf16(v16, w_ref, b_ref):                   # bf16 x bf16 -> f32 acc + f32 bias
    return jnp.dot(v16, w_ref[...],
                   preferred_element_type=jnp.float32) + b_ref[...]

  # ------------- attention + router: runs once per batch element (e == 0) -------------
  @pl.when(e == 0)
  def _attention_and_router():
    x = x_ref[...].astype(jnp.float32)                  # (T, D)
    xn = rmsnorm(x)

    # RoPE on the head-reshaped hidden (interleaved pairs), computed ONCE and
    # reused for Q and K.  Pair swap via XLU rolls + even/odd lane select;
    # sinf already carries the interleaved (-sin, +sin) signs.
    lane = jax.lax.broadcasted_iota(jnp.int32, (T, D), 1)
    even = (lane & 1) == 0
    swapped = jnp.where(even,
                        pltpu.roll(xn, D - 1, 1),       # even lane j -> x[j + 1]
                        pltpu.roll(xn, 1, 1))           # odd  lane j -> x[j - 1]
    xr = xn * cosf_ref[...] + swapped * sinf_ref[...]

    xr16 = xr.astype(jnp.bfloat16)
    xn16 = xn.astype(jnp.bfloat16)
    q = linear_bf16(xr16, wq_ref, bq_ref)               # (T, D) f32
    k = linear_bf16(xr16, wk_ref, bk_ref)
    v = linear_bf16(xn16, wv_ref, bv_ref)               # value is the rms-normed x

    # windowed-causal mask generated in-kernel: masked iff j > i or j <= i - T//2
    row = jax.lax.broadcasted_iota(jnp.int32, (T, T), 0)
    col = jax.lax.broadcasted_iota(jnp.int32, (T, T), 1)
    masked = (col > row) | (col <= row + ((-T) // 2))

    # fold 1/sqrt(head_size) into Q once (single (T, D) VPU mul)
    q16 = (q * (1.0 / math.sqrt(head_size))).astype(jnp.bfloat16)
    k16 = k.astype(jnp.bfloat16)
    v16 = v.astype(jnp.bfloat16)
    ctx_parts = []
    for h in range(num_heads):
      sl = slice(h * head_size, (h + 1) * head_size)
      s = jax.lax.dot_general(q16[:, sl], k16[:, sl], (((1,), (1,)), ((), ())),
                              preferred_element_type=jnp.float32)
      s = jnp.where(masked, -jnp.inf, s)
      m = jnp.max(s, axis=-1, keepdims=True)
      p = jnp.exp(s - m)
      a = p * pl.reciprocal(jnp.sum(p, axis=-1, keepdims=True), approx=True)
      ctx_parts.append(jnp.dot(a.astype(jnp.bfloat16), v16[:, sl],
                               preferred_element_type=jnp.float32))
    ctx = jnp.concatenate(ctx_parts, axis=-1)           # one lane-dense (T, D) value
    attn_out = linear_bf16(ctx.astype(jnp.bfloat16), wo_ref, bo_ref)

    # ---- MoE router + top-k gating on rms_norm(attn_out) (tiny -> keep f32) ----
    xn2 = rmsnorm(attn_out)
    logits = jnp.dot(xn2, wr_ref[...],
                     preferred_element_type=jnp.float32) + br_ref[...]   # (T, E)
    cnt_greater = jnp.zeros_like(logits)
    for i in range(num_experts):
      cnt_greater = cnt_greater + (logits[:, i:i + 1] > logits).astype(jnp.float32)
    in_topk = cnt_greater < float(top_k)
    mmax = jnp.max(logits, axis=-1, keepdims=True)
    pg = jnp.where(in_topk, jnp.exp(logits - mmax), 0.0)  # softmax over sparse logits
    gate = pg / jnp.sum(pg, axis=-1, keepdims=True)       # zero off top-k

    xn2_ref[...] = xn2.astype(xn2_ref.dtype)             # stash bf16 (matmul operand)
    gate_ref[...] = gate
    out_ref[...] = attn_out                              # residual base for MoE accum

  # ------------- one expert per grid step (weights streamed by BlockSpec) -------------
  onehot = jax.lax.broadcasted_iota(jnp.int32, (T, num_experts), 1) == e
  gate_e = jnp.sum(jnp.where(onehot, gate_ref[...], 0.0),
                   axis=-1, keepdims=True)               # (T, 1), 0 where not routed

  x2 = xn2_ref[...]                                       # bf16 (T, D)
  h1 = jnp.dot(x2, w1_ref[...], preferred_element_type=jnp.float32) + b1_ref[...]
  h1 = h1 * jax.nn.sigmoid(h1)                           # SiLU (f32, EUP)
  h2 = jnp.dot(h1.astype(jnp.bfloat16), w2_ref[...],
               preferred_element_type=jnp.float32) + b2_ref[...]
  out_ref[...] = out_ref[...] + gate_e * h2              # dense == sparse: gate is 0 off top-k


PARAM_ORDER = ["scale", "cosf", "sinf",
               "wq", "bq", "wk", "bk", "wv", "bv", "wo", "bo",
               "wr", "br", "w1", "b1", "w2", "b2"]


def init_params(key, T, D, num_heads, num_experts):
  hs = D // num_heads
  dff = 4 * D
  ks = jax.random.split(key, 14)

  def w(k, shape, s=0.02):
    return s * jax.random.normal(k, shape, jnp.float32)

  bf16 = jnp.bfloat16
  p = {}
  p["scale"] = jnp.ones((1, D), jnp.float32)            # torchtune RMSNorm init

  # RoPE tables (torchtune RotaryPositionalEmbeddings, base=10000, dim=head_size).
  # cosf: per-pair cos repeated over the pair and tiled across heads.
  # sinf: same, with the interleaved (-sin, +sin) signs baked in so that
  #       rope(x) = x * cosf + pair_swap(x) * sinf   (no DxD rotation matrix).
  theta = 1.0 / (10000.0 ** (np.arange(0, hs, 2, dtype=np.float32) / hs))
  idx = np.arange(T, dtype=np.float32)[:, None] * theta[None, :]        # (T, hs/2)
  cos_h = np.repeat(np.cos(idx), 2, axis=-1)                            # (T, hs)
  sin_h = np.repeat(np.sin(idx), 2, axis=-1)
  sign = np.tile(np.array([-1.0, 1.0], np.float32), hs // 2)            # (hs,)
  p["cosf"] = jnp.asarray(np.tile(cos_h, (1, num_heads)))               # (T, D)
  p["sinf"] = jnp.asarray(np.tile(sin_h * sign[None, :], (1, num_heads)))

  # MultiheadAttention projections ([in, out] layout); weights bf16, biases f32.
  p["wq"], p["bq"] = w(ks[0], (D, D)).astype(bf16), w(ks[1], (1, D))
  p["wk"], p["bk"] = w(ks[2], (D, D)).astype(bf16), w(ks[3], (1, D))
  p["wv"], p["bv"] = w(ks[4], (D, D)).astype(bf16), w(ks[5], (1, D))
  p["wo"], p["bo"] = w(ks[6], (D, D)).astype(bf16), w(ks[7], (1, D))

  # MoE router (tiny, kept f32 for stable top-k) + stacked experts (bf16).
  p["wr"], p["br"] = w(ks[8], (D, num_experts)), w(ks[9], (1, num_experts))
  p["w1"] = w(ks[10], (num_experts, D, dff)).astype(bf16)
  p["b1"] = w(ks[11], (num_experts, 1, dff))
  p["w2"] = w(ks[12], (num_experts, dff, D)).astype(bf16)
  p["b2"] = w(ks[13], (num_experts, 1, D))
  return p


def mixtral_block(x, params, *, num_heads, num_experts, top_k=2, eps=1e-6):
  B, T, D = x.shape
  head_size = D // num_heads
  dff = params["w1"].shape[-1]
  kernel = functools.partial(
      mixtral_block_kernel, num_heads=num_heads, head_size=head_size,
      num_experts=num_experts, top_k=top_k, eps=eps)

  def const_spec(shape):
    nd = len(shape)
    return pl.BlockSpec(shape, lambda b, e: (0,) * nd)   # grid-invariant -> DMA'd once

  in_specs = (
      [pl.BlockSpec((None, T, D), lambda b, e: (b, 0, 0))]            # x
      + [const_spec(params[k].shape) for k in
         ("scale", "cosf", "sinf",
          "wq", "bq", "wk", "bk", "wv", "bv", "wo", "bo", "wr", "br")]
      + [pl.BlockSpec((None, D, dff), lambda b, e: (e, 0, 0)),        # w1[e] (streamed)
         pl.BlockSpec((None, 1, dff), lambda b, e: (e, 0, 0)),        # b1[e]
         pl.BlockSpec((None, dff, D), lambda b, e: (e, 0, 0)),        # w2[e] (streamed)
         pl.BlockSpec((None, 1, D), lambda b, e: (e, 0, 0))])         # b2[e]

  return pl.pallas_call(
      kernel,
      out_shape=jax.ShapeDtypeStruct((B, T, D), jnp.float32),
      grid=(B, num_experts),
      in_specs=in_specs,
      out_specs=pl.BlockSpec((None, T, D), lambda b, e: (b, 0, 0)),
      scratch_shapes=[pltpu.VMEM((T, D), jnp.bfloat16),               # rms_norm(attn_out)
                      pltpu.VMEM((T, num_experts), jnp.float32)],     # top-k gates
      compiler_params=pltpu.CompilerParams(
          dimension_semantics=("parallel", "arbitrary"),
          # sized to leave headroom under v7x's 64 MiB physical VMEM
          vmem_limit_bytes=48 * 1024 * 1024),
  )(x, *[params[k] for k in PARAM_ORDER])


if __name__ == "__main__":
  B, T, D = 2, 8, 128           # batch, seq (== context_length), d_model (lane-aligned)
  num_heads, num_experts, top_k = 4, 4, 2

  key = jax.random.PRNGKey(0)
  kx, kp = jax.random.split(key)
  x = jax.random.normal(kx, (B, T, D), jnp.float32)
  params = init_params(kp, T, D, num_heads, num_experts)

  out = mixtral_block(x, params, num_heads=num_heads,
                      num_experts=num_experts, top_k=top_k)
  out = jax.block_until_ready(out)

  assert out.shape == (B, T, D)
  assert bool(jnp.all(jnp.isfinite(out)))
  print("KERNEL_OK")
</pallas_src>

<mosaic_0001>
module attributes {stable_mosaic.version = 11 : i64} {
  func.func @mixtral_block_kernel(%arg0: i32, %arg1: i32, %arg2: memref<1x8x128xf32, #tpu.memory_space<vmem>>, %arg3: memref<1x128xf32, #tpu.memory_space<vmem>>, %arg4: memref<8x128xf32, #tpu.memory_space<vmem>>, %arg5: memref<8x128xf32, #tpu.memory_space<vmem>>, %arg6: memref<128x128xbf16, #tpu.memory_space<vmem>>, %arg7: memref<1x128xf32, #tpu.memory_space<vmem>>, %arg8: memref<128x128xbf16, #tpu.memory_space<vmem>>, %arg9: memref<1x128xf32, #tpu.memory_space<vmem>>, %arg10: memref<128x128xbf16, #tpu.memory_space<vmem>>, %arg11: memref<1x128xf32, #tpu.memory_space<vmem>>, %arg12: memref<128x128xbf16, #tpu.memory_space<vmem>>, %arg13: memref<1x128xf32, #tpu.memory_space<vmem>>, %arg14: memref<128x4xf32, #tpu.memory_space<vmem>>, %arg15: memref<1x4xf32, #tpu.memory_space<vmem>>, %arg16: memref<1x128x512xbf16, #tpu.memory_space<vmem>>, %arg17: memref<1x1x512xf32, #tpu.memory_space<vmem>>, %arg18: memref<1x512x128xbf16, #tpu.memory_space<vmem>>, %arg19: memref<1x1x128xf32, #tpu.memory_space<vmem>>, %arg20: memref<1x8x128xf32, #tpu.memory_space<vmem>>, %arg21: memref<8x128xbf16, #tpu.memory_space<vmem>>, %arg22: memref<8x4xf32, #tpu.memory_space<vmem>>) attributes {dimension_semantics = [#tpu.dimension_semantics<parallel>, #tpu.dimension_semantics<arbitrary>], iteration_bounds = array<i64: 2, 4>, scalar_prefetch = 0 : i64, scratch_operands = 2 : i64, tpu.core_type = #tpu.core_type<tc>, window_params = [{transform_indices = @transform_0, window_bounds = array<i64: 1, 8, 128>}, {pipeline_mode = #tpu.pipeline_mode<synchronous>, transform_indices = @transform_1, window_bounds = array<i64: 1, 128>}, {pipeline_mode = #tpu.pipeline_mode<synchronous>, transform_indices = @transform_2, window_bounds = array<i64: 8, 128>}, {pipeline_mode = #tpu.pipeline_mode<synchronous>, transform_indices = @transform_3, window_bounds = array<i64: 8, 128>}, {pipeline_mode = #tpu.pipeline_mode<synchronous>, transform_indices = @transform_4, window_bounds = array<i64: 128, 128>}, {pipeline_mode = #tpu.pipeline_mode<synchronous>, transform_indices = @transform_5, window_bounds = array<i64: 1, 128>}, {pipeline_mode = #tpu.pipeline_mode<synchronous>, transform_indices = @transform_6, window_bounds = array<i64: 128, 128>}, {pipeline_mode = #tpu.pipeline_mode<synchronous>, transform_indices = @transform_7, window_bounds = array<i64: 1, 128>}, {pipeline_mode = #tpu.pipeline_mode<synchronous>, transform_indices = @transform_8, window_bounds = array<i64: 128, 128>}, {pipeline_mode = #tpu.pipeline_mode<synchronous>, transform_indices = @transform_9, window_bounds = array<i64: 1, 128>}, {pipeline_mode = #tpu.pipeline_mode<synchronous>, transform_indices = @transform_10, window_bounds = array<i64: 128, 128>}, {pipeline_mode = #tpu.pipeline_mode<synchronous>, transform_indices = @transform_11, window_bounds = array<i64: 1, 128>}, {pipeline_mode = #tpu.pipeline_mode<synchronous>, transform_indices = @transform_12, window_bounds = array<i64: 128, 4>}, {pipeline_mode = #tpu.pipeline_mode<synchronous>, transform_indices = @transform_13, window_bounds = array<i64: 1, 4>}, {transform_indices = @transform_14, window_bounds = array<i64: 1, 128, 512>}, {transform_indices = @transform_15, window_bounds = array<i64: 1, 1, 512>}, {transform_indices = @transform_16, window_bounds = array<i64: 1, 512, 128>}, {transform_indices = @transform_17, window_bounds = array<i64: 1, 1, 128>}, {transform_indices = @transform_18, window_bounds = array<i64: 1, 8, 128>}]} {
    %c0_i32 = arith.constant 0 : i32
    %0 = arith.cmpi eq, %arg1, %c0_i32 : i32
    %1 = arith.extui %0 : i1 to i32
    %c0_i32_0 = arith.constant 0 : i32
    %2 = arith.cmpi ne, %1, %c0_i32_0 : i32
    scf.if %2 {
      %c0_26 = arith.constant 0 : index
      %c0_27 = arith.constant 0 : index
      %c0_28 = arith.constant 0 : index
      %41 = vector.load %arg2[%c0_26, %c0_27, %c0_28] : memref<1x8x128xf32, #tpu.memory_space<vmem>>, vector<1x8x128xf32>
      %42 = vector.shape_cast %41 : vector<1x8x128xf32> to vector<8x128xf32>
      %43 = arith.mulf %42, %42 : vector<8x128xf32>
      %cst_29 = arith.constant dense<0.000000e+00> : vector<8xf32>
      %44 = vector.multi_reduction <add>, %43, %cst_29 [1] : vector<8x128xf32> to vector<8xf32>
      %45 = vector.shape_cast %44 : vector<8xf32> to vector<8x1xf32>
      %cst_30 = arith.constant 1.280000e+02 : f32
      %46 = vector.broadcast %cst_30 : f32 to vector<8x1xf32>
      %47 = arith.divf %45, %46 : vector<8x1xf32>
      %cst_31 = arith.constant 9.99999997E-7 : f32
      %48 = vector.broadcast %cst_31 : f32 to vector<8x1xf32>
      %49 = arith.addf %47, %48 : vector<8x1xf32>
      %50 = math.rsqrt %49 : vector<8x1xf32>
      %51 = vector.broadcast %50 : vector<8x1xf32> to vector<8x128xf32>
      %52 = arith.mulf %42, %51 : vector<8x128xf32>
      %c0_32 = arith.constant 0 : index
      %c0_33 = arith.constant 0 : index
      %53 = vector.load %arg3[%c0_32, %c0_33] : memref<1x128xf32, #tpu.memory_space<vmem>>, vector<1x128xf32>
      %54 = vector.broadcast %53 : vector<1x128xf32> to vector<8x128xf32>
      %55 = arith.mulf %52, %54 : vector<8x128xf32>
      %56 = tpu.iota {dimensions = array<i32: 1>} : vector<8x128xi32>
      %c1_i32 = arith.constant 1 : i32
      %57 = vector.broadcast %c1_i32 : i32 to vector<8x128xi32>
      %58 = arith.andi %56, %57 : vector<8x128xi32>
      %c0_i32_34 = arith.constant 0 : i32
      %59 = vector.broadcast %c0_i32_34 : i32 to vector<8x128xi32>
      %60 = arith.cmpi eq, %58, %59 : vector<8x128xi32>
      %c127_i32 = arith.constant 127 : i32
      %61 = tpu.dynamic_rotate %55 by %c127_i32 dim 1 : vector<8x128xf32>, i32 -> vector<8x128xf32>
      %c1_i32_35 = arith.constant 1 : i32
      %62 = tpu.dynamic_rotate %55 by %c1_i32_35 dim 1 : vector<8x128xf32>, i32 -> vector<8x128xf32>
      %63 = arith.select %60, %61, %62 : vector<8x128xi1>, vector<8x128xf32>
      %c0_36 = arith.constant 0 : index
      %c0_37 = arith.constant 0 : index
      %64 = vector.load %arg4[%c0_36, %c0_37] : memref<8x128xf32, #tpu.memory_space<vmem>>, vector<8x128xf32>
      %65 = arith.mulf %55, %64 : vector<8x128xf32>
      %c0_38 = arith.constant 0 : index
      %c0_39 = arith.constant 0 : index
      %66 = vector.load %arg5[%c0_38, %c0_39] : memref<8x128xf32, #tpu.memory_space<vmem>>, vector<8x128xf32>
      %67 = arith.mulf %63, %66 : vector<8x128xf32>
      %68 = arith.addf %65, %67 : vector<8x128xf32>
      %69 = arith.truncf %68 : vector<8x128xf32> to vector<8x128xbf16>
      %70 = arith.truncf %55 : vector<8x128xf32> to vector<8x128xbf16>
      %c0_40 = arith.constant 0 : index
      %c0_41 = arith.constant 0 : index
      %71 = vector.load %arg6[%c0_40, %c0_41] : memref<128x128xbf16, #tpu.memory_space<vmem>>, vector<128x128xbf16>
      %cst_42 = arith.constant dense<0.000000e+00> : vector<8x128xf32>
      %72 = tpu.matmul %69, %71, %cst_42 {dimension_numbers = #tpu.dot_dimension_numbers<[1], [0], [0], [1], [0, 0, 1, 1], [], []>} : vector<8x128xbf16>, vector<128x128xbf16>, vector<8x128xf32> -> vector<8x128xf32>
      %c0_43 = arith.constant 0 : index
      %c0_44 = arith.constant 0 : index
      %73 = vector.load %arg7[%c0_43, %c0_44] : memref<1x128xf32, #tpu.memory_space<vmem>>, vector<1x128xf32>
      %74 = vector.broadcast %73 : vector<1x128xf32> to vector<8x128xf32>
      %75 = arith.addf %72, %74 : vector<8x128xf32>
      %c0_45 = arith.constant 0 : index
      %c0_46 = arith.constant 0 : index
      %76 = vector.load %arg8[%c0_45, %c0_46] : memref<128x128xbf16, #tpu.memory_space<vmem>>, vector<128x128xbf16>
      %cst_47 = arith.constant dense<0.000000e+00> : vector<8x128xf32>
      %77 = tpu.matmul %69, %76, %cst_47 {dimension_numbers = #tpu.dot_dimension_numbers<[1], [0], [0], [1], [0, 0, 1, 1], [], []>} : vector<8x128xbf16>, vector<128x128xbf16>, vector<8x128xf32> -> vector<8x128xf32>
      %c0_48 = arith.constant 0 : index
      %c0_49 = arith.constant 0 : index
      %78 = vector.load %arg9[%c0_48, %c0_49] : memref<1x128xf32, #tpu.memory_space<vmem>>, vector<1x128xf32>
      %79 = vector.broadcast %78 : vector<1x128xf32> to vector<8x128xf32>
      %80 = arith.addf %77, %79 : vector<8x128xf32>
      %c0_50 = arith.constant 0 : index
      %c0_51 = arith.constant 0 : index
      %81 = vector.load %arg10[%c0_50, %c0_51] : memref<128x128xbf16, #tpu.memory_space<vmem>>, vector<128x128xbf16>
      %cst_52 = arith.constant dense<0.000000e+00> : vector<8x128xf32>
      %82 = tpu.matmul %70, %81, %cst_52 {dimension_numbers = #tpu.dot_dimension_numbers<[1], [0], [0], [1], [0, 0, 1, 1], [], []>} : vector<8x128xbf16>, vector<128x128xbf16>, vector<8x128xf32> -> vector<8x128xf32>
      %c0_53 = arith.constant 0 : index
      %c0_54 = arith.constant 0 : index
      %83 = vector.load %arg11[%c0_53, %c0_54] : memref<1x128xf32, #tpu.memory_space<vmem>>, vector<1x128xf32>
      %84 = vector.broadcast %83 : vector<1x128xf32> to vector<8x128xf32>
      %85 = arith.addf %82, %84 : vector<8x128xf32>
      %86 = tpu.iota {dimensions = array<i32: 0>} : vector<8x8xi32>
      %87 = tpu.iota {dimensions = array<i32: 1>} : vector<8x8xi32>
      %88 = arith.cmpi sgt, %87, %86 : vector<8x8xi32>
      %c-4_i32 = arith.constant -4 : i32
      %89 = vector.broadcast %c-4_i32 : i32 to vector<8x8xi32>
      %90 = arith.addi %86, %89 : vector<8x8xi32>
      %91 = arith.cmpi sle, %87, %90 : vector<8x8xi32>
      %92 = arith.ori %88, %91 : vector<8x8xi1>
      %cst_55 = arith.constant 0.176776692 : f32
      %93 = vector.broadcast %cst_55 : f32 to vector<8x128xf32>
      %94 = arith.mulf %75, %93 : vector<8x128xf32>
      %95 = arith.truncf %94 : vector<8x128xf32> to vector<8x128xbf16>
      %96 = arith.truncf %80 : vector<8x128xf32> to vector<8x128xbf16>
      %97 = arith.truncf %85 : vector<8x128xf32> to vector<8x128xbf16>
      %98 = vector.extract_strided_slice %95 {offsets = [0, 0], sizes = [8, 32], strides = [1, 1]} : vector<8x128xbf16> to vector<8x32xbf16>
      %99 = vector.extract_strided_slice %96 {offsets = [0, 0], sizes = [8, 32], strides = [1, 1]} : vector<8x128xbf16> to vector<8x32xbf16>
      %cst_56 = arith.constant dense<0.000000e+00> : vector<8x8xf32>
      %100 = tpu.matmul %98, %99, %cst_56 {dimension_numbers = #tpu.dot_dimension_numbers<[1], [1], [0], [0], [0, 0, 1, 0], [], []>} : vector<8x32xbf16>, vector<8x32xbf16>, vector<8x8xf32> -> vector<8x8xf32>
      %cst_57 = arith.constant 0xFF800000 : f32
      %101 = vector.broadcast %cst_57 : f32 to vector<8x8xf32>
      %102 = arith.select %92, %101, %100 : vector<8x8xi1>, vector<8x8xf32>
      %cst_58 = arith.constant dense<0xFF800000> : vector<8xf32>
      %103 = vector.multi_reduction <maximumf>, %102, %cst_58 [1] : vector<8x8xf32> to vector<8xf32>
      %104 = vector.shape_cast %103 : vector<8xf32> to vector<8x1xf32>
      %105 = vector.broadcast %104 : vector<8x1xf32> to vector<8x8xf32>
      %106 = arith.subf %102, %105 : vector<8x8xf32>
      %107 = math.exp %106 : vector<8x8xf32>
      %cst_59 = arith.constant dense<0.000000e+00> : vector<8xf32>
      %108 = vector.multi_reduction <add>, %107, %cst_59 [1] : vector<8x8xf32> to vector<8xf32>
      %109 = vector.shape_cast %108 : vector<8xf32> to vector<8x1xf32>
      %110 = tpu.reciprocal %109 {approx = true} : vector<8x1xf32> -> vector<8x1xf32>
      %111 = vector.broadcast %110 : vector<8x1xf32> to vector<8x8xf32>
      %112 = arith.mulf %107, %111 : vector<8x8xf32>
      %113 = arith.truncf %112 : vector<8x8xf32> to vector<8x8xbf16>
      %114 = vector.extract_strided_slice %97 {offsets = [0, 0], sizes = [8, 32], strides = [1, 1]} : vector<8x128xbf16> to vector<8x32xbf16>
      %cst_60 = arith.constant dense<0.000000e+00> : vector<8x32xf32>
      %115 = tpu.matmul %113, %114, %cst_60 {dimension_numbers = #tpu.dot_dimension_numbers<[1], [0], [0], [1], [0, 0, 1, 1], [], []>} : vector<8x8xbf16>, vector<8x32xbf16>, vector<8x32xf32> -> vector<8x32xf32>
      %116 = vector.extract_strided_slice %95 {offsets = [0, 32], sizes = [8, 32], strides = [1, 1]} : vector<8x128xbf16> to vector<8x32xbf16>
      %117 = vector.extract_strided_slice %96 {offsets = [0, 32], sizes = [8, 32], strides = [1, 1]} : vector<8x128xbf16> to vector<8x32xbf16>
      %cst_61 = arith.constant dense<0.000000e+00> : vector<8x8xf32>
      %118 = tpu.matmul %116, %117, %cst_61 {dimension_numbers = #tpu.dot_dimension_numbers<[1], [1], [0], [0], [0, 0, 1, 0], [], []>} : vector<8x32xbf16>, vector<8x32xbf16>, vector<8x8xf32> -> vector<8x8xf32>
      %cst_62 = arith.constant 0xFF800000 : f32
      %119 = vector.broadcast %cst_62 : f32 to vector<8x8xf32>
      %120 = arith.select %92, %119, %118 : vector<8x8xi1>, vector<8x8xf32>
      %cst_63 = arith.constant dense<0xFF800000> : vector<8xf32>
      %121 = vector.multi_reduction <maximumf>, %120, %cst_63 [1] : vector<8x8xf32> to vector<8xf32>
      %122 = vector.shape_cast %121 : vector<8xf32> to vector<8x1xf32>
      %123 = vector.broadcast %122 : vector<8x1xf32> to vector<8x8xf32>
      %124 = arith.subf %120, %123 : vector<8x8xf32>
      %125 = math.exp %124 : vector<8x8xf32>
      %cst_64 = arith.constant dense<0.000000e+00> : vector<8xf32>
      %126 = vector.multi_reduction <add>, %125, %cst_64 [1] : vector<8x8xf32> to vector<8xf32>
      %127 = vector.shape_cast %126 : vector<8xf32> to vector<8x1xf32>
      %128 = tpu.reciprocal %127 {approx = true} : vector<8x1xf32> -> vector<8x1xf32>
      %129 = vector.broadcast %128 : vector<8x1xf32> to vector<8x8xf32>
      %130 = arith.mulf %125, %129 : vector<8x8xf32>
      %131 = arith.truncf %130 : vector<8x8xf32> to vector<8x8xbf16>
      %132 = vector.extract_strided_slice %97 {offsets = [0, 32], sizes = [8, 32], strides = [1, 1]} : vector<8x128xbf16> to vector<8x32xbf16>
      %cst_65 = arith.constant dense<0.000000e+00> : vector<8x32xf32>
      %133 = tpu.matmul %131, %132, %cst_65 {dimension_numbers = #tpu.dot_dimension_numbers<[1], [0], [0], [1], [0, 0, 1, 1], [], []>} : vector<8x8xbf16>, vector<8x32xbf16>, vector<8x32xf32> -> vector<8x32xf32>
      %134 = vector.extract_strided_slice %95 {offsets = [0, 64], sizes = [8, 32], strides = [1, 1]} : vector<8x128xbf16> to vector<8x32xbf16>
      %135 = vector.extract_strided_slice %96 {offsets = [0, 64], sizes = [8, 32], strides = [1, 1]} : vector<8x128xbf16> to vector<8x32xbf16>
      %cst_66 = arith.constant dense<0.000000e+00> : vector<8x8xf32>
      %136 = tpu.matmul %134, %135, %cst_66 {dimension_numbers = #tpu.dot_dimension_numbers<[1], [1], [0], [0], [0, 0, 1, 0], [], []>} : vector<8x32xbf16>, vector<8x32xbf16>, vector<8x8xf32> -> vector<8x8xf32>
      %cst_67 = arith.constant 0xFF800000 : f32
      %137 = vector.broadcast %cst_67 : f32 to vector<8x8xf32>
      %138 = arith.select %92, %137, %136 : vector<8x8xi1>, vector<8x8xf32>
      %cst_68 = arith.constant dense<0xFF800000> : vector<8xf32>
      %139 = vector.multi_reduction <maximumf>, %138, %cst_68 [1] : vector<8x8xf32> to vector<8xf32>
      %140 = vector.shape_cast %139 : vector<8xf32> to vector<8x1xf32>
      %141 = vector.broadcast %140 : vector<8x1xf32> to vector<8x8xf32>
      %142 = arith.subf %138, %141 : vector<8x8xf32>
      %143 = math.exp %142 : vector<8x8xf32>
      %cst_69 = arith.constant dense<0.000000e+00> : vector<8xf32>
      %144 = vector.multi_reduction <add>, %143, %cst_69 [1] : vector<8x8xf32> to vector<8xf32>
      %145 = vector.shape_cast %144 : vector<8xf32> to vector<8x1xf32>
      %146 = tpu.reciprocal %145 {approx = true} : vector<8x1xf32> -> vector<8x1xf32>
      %147 = vector.broadcast %146 : vector<8x1xf32> to vector<8x8xf32>
      %148 = arith.mulf %143, %147 : vector<8x8xf32>
      %149 = arith.truncf %148 : vector<8x8xf32> to vector<8x8xbf16>
      %150 = vector.extract_strided_slice %97 {offsets = [0, 64], sizes = [8, 32], strides = [1, 1]} : vector<8x128xbf16> to vector<8x32xbf16>
      %cst_70 = arith.constant dense<0.000000e+00> : vector<8x32xf32>
      %151 = tpu.matmul %149, %150, %cst_70 {dimension_numbers = #tpu.dot_dimension_numbers<[1], [0], [0], [1], [0, 0, 1, 1], [], []>} : vector<8x8xbf16>, vector<8x32xbf16>, vector<8x32xf32> -> vector<8x32xf32>
      %152 = vector.extract_strided_slice %95 {offsets = [0, 96], sizes = [8, 32], strides = [1, 1]} : vector<8x128xbf16> to vector<8x32xbf16>
      %153 = vector.extract_strided_slice %96 {offsets = [0, 96], sizes = [8, 32], strides = [1, 1]} : vector<8x128xbf16> to vector<8x32xbf16>
      %cst_71 = arith.constant dense<0.000000e+00> : vector<8x8xf32>
      %154 = tpu.matmul %152, %153, %cst_71 {dimension_numbers = #tpu.dot_dimension_numbers<[1], [1], [0], [0], [0, 0, 1, 0], [], []>} : vector<8x32xbf16>, vector<8x32xbf16>, vector<8x8xf32> -> vector<8x8xf32>
      %cst_72 = arith.constant 0xFF800000 : f32
      %155 = vector.broadcast %cst_72 : f32 to vector<8x8xf32>
      %156 = arith.select %92, %155, %154 : vector<8x8xi1>, vector<8x8xf32>
      %cst_73 = arith.constant dense<0xFF800000> : vector<8xf32>
      %157 = vector.multi_reduction <maximumf>, %156, %cst_73 [1] : vector<8x8xf32> to vector<8xf32>
      %158 = vector.shape_cast %157 : vector<8xf32> to vector<8x1xf32>
      %159 = vector.broadcast %158 : vector<8x1xf32> to vector<8x8xf32>
      %160 = arith.subf %156, %159 : vector<8x8xf32>
      %161 = math.exp %160 : vector<8x8xf32>
      %cst_74 = arith.constant dense<0.000000e+00> : vector<8xf32>
      %162 = vector.multi_reduction <add>, %161, %cst_74 [1] : vector<8x8xf32> to vector<8xf32>
      %163 = vector.shape_cast %162 : vector<8xf32> to vector<8x1xf32>
      %164 = tpu.reciprocal %163 {approx = true} : vector<8x1xf32> -> vector<8x1xf32>
      %165 = vector.broadcast %164 : vector<8x1xf32> to vector<8x8xf32>
      %166 = arith.mulf %161, %165 : vector<8x8xf32>
      %167 = arith.truncf %166 : vector<8x8xf32> to vector<8x8xbf16>
      %168 = vector.extract_strided_slice %97 {offsets = [0, 96], sizes = [8, 32], strides = [1, 1]} : vector<8x128xbf16> to vector<8x32xbf16>
      %cst_75 = arith.constant dense<0.000000e+00> : vector<8x32xf32>
      %169 = tpu.matmul %167, %168, %cst_75 {dimension_numbers = #tpu.dot_dimension_numbers<[1], [0], [0], [1], [0, 0, 1, 1], [], []>} : vector<8x8xbf16>, vector<8x32xbf16>, vector<8x32xf32> -> vector<8x32xf32>
      %170 = tpu.concatenate %115, %133, %151, %169 in 1 : vector<8x32xf32>, vector<8x32xf32>, vector<8x32xf32>, vector<8x32xf32> -> vector<8x128xf32>
      %171 = arith.truncf %170 : vector<8x128xf32> to vector<8x128xbf16>
      %c0_76 = arith.constant 0 : index
      %c0_77 = arith.constant 0 : index
      %172 = vector.load %arg12[%c0_76, %c0_77] : memref<128x128xbf16, #tpu.memory_space<vmem>>, vector<128x128xbf16>
      %cst_78 = arith.constant dense<0.000000e+00> : vector<8x128xf32>
      %173 = tpu.matmul %171, %172, %cst_78 {dimension_numbers = #tpu.dot_dimension_numbers<[1], [0], [0], [1], [0, 0, 1, 1], [], []>} : vector<8x128xbf16>, vector<128x128xbf16>, vector<8x128xf32> -> vector<8x128xf32>
      %c0_79 = arith.constant 0 : index
      %c0_80 = arith.constant 0 : index
      %174 = vector.load %arg13[%c0_79, %c0_80] : memref<1x128xf32, #tpu.memory_space<vmem>>, vector<1x128xf32>
      %175 = vector.broadcast %174 : vector<1x128xf32> to vector<8x128xf32>
      %176 = arith.addf %173, %175 : vector<8x128xf32>
      %177 = arith.mulf %176, %176 : vector<8x128xf32>
      %cst_81 = arith.constant dense<0.000000e+00> : vector<8xf32>
      %178 = vector.multi_reduction <add>, %177, %cst_81 [1] : vector<8x128xf32> to vector<8xf32>
      %179 = vector.shape_cast %178 : vector<8xf32> to vector<8x1xf32>
      %cst_82 = arith.constant 1.280000e+02 : f32
      %180 = vector.broadcast %cst_82 : f32 to vector<8x1xf32>
      %181 = arith.divf %179, %180 : vector<8x1xf32>
      %cst_83 = arith.constant 9.99999997E-7 : f32
      %182 = vector.broadcast %cst_83 : f32 to vector<8x1xf32>
      %183 = arith.addf %181, %182 : vector<8x1xf32>
      %184 = math.rsqrt %183 : vector<8x1xf32>
      %185 = vector.broadcast %184 : vector<8x1xf32> to vector<8x128xf32>
      %186 = arith.mulf %176, %185 : vector<8x128xf32>
      %c0_84 = arith.constant 0 : index
      %c0_85 = arith.constant 0 : index
      %187 = vector.load %arg3[%c0_84, %c0_85] : memref<1x128xf32, #tpu.memory_space<vmem>>, vector<1x128xf32>
      %188 = vector.broadcast %187 : vector<1x128xf32> to vector<8x128xf32>
      %189 = arith.mulf %186, %188 : vector<8x128xf32>
      %c0_86 = arith.constant 0 : index
      %c0_87 = arith.constant 0 : index
      %190 = vector.load %arg14[%c0_86, %c0_87] : memref<128x4xf32, #tpu.memory_space<vmem>>, vector<128x4xf32>
      %cst_88 = arith.constant dense<0.000000e+00> : vector<8x4xf32>
      %191 = tpu.matmul %189, %190, %cst_88 {dimension_numbers = #tpu.dot_dimension_numbers<[1], [0], [0], [1], [0, 0, 1, 1], [], []>} : vector<8x128xf32>, vector<128x4xf32>, vector<8x4xf32> -> vector<8x4xf32>
      %c0_89 = arith.constant 0 : index
      %c0_90 = arith.constant 0 : index
      %192 = vector.load %arg15[%c0_89, %c0_90] : memref<1x4xf32, #tpu.memory_space<vmem>>, vector<1x4xf32>
      %193 = vector.broadcast %192 : vector<1x4xf32> to vector<8x4xf32>
      %194 = arith.addf %191, %193 : vector<8x4xf32>
      %cst_91 = arith.constant 0.000000e+00 : f32
      %195 = vector.broadcast %cst_91 : f32 to vector<8x4xf32>
      %196 = vector.extract_strided_slice %194 {offsets = [0, 0], sizes = [8, 1], strides = [1, 1]} : vector<8x4xf32> to vector<8x1xf32>
      %197 = vector.broadcast %196 : vector<8x1xf32> to vector<8x4xf32>
      %198 = arith.cmpf ogt, %197, %194 : vector<8x4xf32>
      %199 = arith.extui %198 : vector<8x4xi1> to vector<8x4xi32>
      %200 = arith.sitofp %199 : vector<8x4xi32> to vector<8x4xf32>
      %201 = arith.addf %195, %200 : vector<8x4xf32>
      %202 = vector.extract_strided_slice %194 {offsets = [0, 1], sizes = [8, 1], strides = [1, 1]} : vector<8x4xf32> to vector<8x1xf32>
      %203 = vector.broadcast %202 : vector<8x1xf32> to vector<8x4xf32>
      %204 = arith.cmpf ogt, %203, %194 : vector<8x4xf32>
      %205 = arith.extui %204 : vector<8x4xi1> to vector<8x4xi32>
      %206 = arith.sitofp %205 : vector<8x4xi32> to vector<8x4xf32>
      %207 = arith.addf %201, %206 : vector<8x4xf32>
      %208 = vector.extract_strided_slice %194 {offsets = [0, 2], sizes = [8, 1], strides = [1, 1]} : vector<8x4xf32> to vector<8x1xf32>
      %209 = vector.broadcast %208 : vector<8x1xf32> to vector<8x4xf32>
      %210 = arith.cmpf ogt, %209, %194 : vector<8x4xf32>
      %211 = arith.extui %210 : vector<8x4xi1> to vector<8x4xi32>
      %212 = arith.sitofp %211 : vector<8x4xi32> to vector<8x4xf32>
      %213 = arith.addf %207, %212 : vector<8x4xf32>
      %214 = vector.extract_strided_slice %194 {offsets = [0, 3], sizes = [8, 1], strides = [1, 1]} : vector<8x4xf32> to vector<8x1xf32>
      %215 = vector.broadcast %214 : vector<8x1xf32> to vector<8x4xf32>
      %216 = arith.cmpf ogt, %215, %194 : vector<8x4xf32>
      %217 = arith.extui %216 : vector<8x4xi1> to vector<8x4xi32>
      %218 = arith.sitofp %217 : vector<8x4xi32> to vector<8x4xf32>
      %219 = arith.addf %213, %218 : vector<8x4xf32>
      %cst_92 = arith.constant 2.000000e+00 : f32
      %220 = vector.broadcast %cst_92 : f32 to vector<8x4xf32>
      %221 = arith.cmpf olt, %219, %220 : vector<8x4xf32>
      %cst_93 = arith.constant dense<0xFF800000> : vector<8xf32>
      %222 = vector.multi_reduction <maximumf>, %194, %cst_93 [1] : vector<8x4xf32> to vector<8xf32>
      %223 = vector.shape_cast %222 : vector<8xf32> to vector<8x1xf32>
      %224 = vector.broadcast %223 : vector<8x1xf32> to vector<8x4xf32>
      %225 = arith.subf %194, %224 : vector<8x4xf32>
      %226 = math.exp %225 : vector<8x4xf32>
      %cst_94 = arith.constant 0.000000e+00 : f32
      %227 = vector.broadcast %cst_94 : f32 to vector<8x4xf32>
      %228 = arith.select %221, %226, %227 : vector<8x4xi1>, vector<8x4xf32>
      %cst_95 = arith.constant dense<0.000000e+00> : vector<8xf32>
      %229 = vector.multi_reduction <add>, %228, %cst_95 [1] : vector<8x4xf32> to vector<8xf32>
      %230 = vector.shape_cast %229 : vector<8xf32> to vector<8x1xf32>
      %231 = vector.broadcast %230 : vector<8x1xf32> to vector<8x4xf32>
      %232 = arith.divf %228, %231 : vector<8x4xf32>
      %233 = arith.truncf %189 : vector<8x128xf32> to vector<8x128xbf16>
      %c0_96 = arith.constant 0 : index
      %c0_97 = arith.constant 0 : index
      %234 = vector.load %arg21[%c0_96, %c0_97] : memref<8x128xbf16, #tpu.memory_space<vmem>>, vector<8x128xbf16>
      tpu.vector_store %arg21[%c0_96, %c0_97], %233 {strides = array<i32>} : memref<8x128xbf16, #tpu.memory_space<vmem>>, vector<8x128xbf16>,
      %c0_98 = arith.constant 0 : index
      %c0_99 = arith.constant 0 : index
      %235 = vector.load %arg22[%c0_98, %c0_99] : memref<8x4xf32, #tpu.memory_space<vmem>>, vector<8x4xf32>
      tpu.vector_store %arg22[%c0_98, %c0_99], %232 {strides = array<i32>} : memref<8x4xf32, #tpu.memory_space<vmem>>, vector<8x4xf32>,
      %c0_100 = arith.constant 0 : index
      %c0_101 = arith.constant 0 : index
      %c0_102 = arith.constant 0 : index
      %236 = vector.load %arg20[%c0_100, %c0_101, %c0_102] : memref<1x8x128xf32, #tpu.memory_space<vmem>>, vector<1x8x128xf32>
      %237 = vector.shape_cast %236 : vector<1x8x128xf32> to vector<8x128xf32>
      %238 = vector.shape_cast %176 : vector<8x128xf32> to vector<1x8x128xf32>
      tpu.vector_store %arg20[%c0_100, %c0_101, %c0_102], %238 {strides = array<i32>} : memref<1x8x128xf32, #tpu.memory_space<vmem>>, vector<1x8x128xf32>,
    } else {
    }
    %3 = tpu.iota {dimensions = array<i32: 1>} : vector<8x4xi32>
    %4 = vector.broadcast %arg1 : i32 to vector<8x4xi32>
    %5 = arith.cmpi eq, %3, %4 : vector<8x4xi32>
    %c0 = arith.constant 0 : index
    %c0_1 = arith.constant 0 : index
    %6 = vector.load %arg22[%c0, %c0_1] : memref<8x4xf32, #tpu.memory_space<vmem>>, vector<8x4xf32>
    %cst = arith.constant 0.000000e+00 : f32
    %7 = vector.broadcast %cst : f32 to vector<8x4xf32>
    %8 = arith.select %5, %6, %7 : vector<8x4xi1>, vector<8x4xf32>
    %cst_2 = arith.constant dense<0.000000e+00> : vector<8xf32>
    %9 = vector.multi_reduction <add>, %8, %cst_2 [1] : vector<8x4xf32> to vector<8xf32>
    %10 = vector.shape_cast %9 : vector<8xf32> to vector<8x1xf32>
    %c0_3 = arith.constant 0 : index
    %c0_4 = arith.constant 0 : index
    %11 = vector.load %arg21[%c0_3, %c0_4] : memref<8x128xbf16, #tpu.memory_space<vmem>>, vector<8x128xbf16>
    %c0_5 = arith.constant 0 : index
    %c0_6 = arith.constant 0 : index
    %c0_7 = arith.constant 0 : index
    %12 = vector.load %arg16[%c0_5, %c0_6, %c0_7] : memref<1x128x512xbf16, #tpu.memory_space<vmem>>, vector<1x128x512xbf16>
    %13 = vector.shape_cast %12 : vector<1x128x512xbf16> to vector<128x512xbf16>
    %cst_8 = arith.constant dense<0.000000e+00> : vector<8x512xf32>
    %14 = tpu.matmul %11, %13, %cst_8 {dimension_numbers = #tpu.dot_dimension_numbers<[1], [0], [0], [1], [0, 0, 1, 1], [], []>} : vector<8x128xbf16>, vector<128x512xbf16>, vector<8x512xf32> -> vector<8x512xf32>
    %c0_9 = arith.constant 0 : index
    %c0_10 = arith.constant 0 : index
    %c0_11 = arith.constant 0 : index
    %15 = vector.load %arg17[%c0_9, %c0_10, %c0_11] : memref<1x1x512xf32, #tpu.memory_space<vmem>>, vector<1x1x512xf32>
    %16 = vector.shape_cast %15 : vector<1x1x512xf32> to vector<1x512xf32>
    %17 = vector.broadcast %16 : vector<1x512xf32> to vector<8x512xf32>
    %18 = arith.addf %14, %17 : vector<8x512xf32>
    %19 = arith.negf %18 : vector<8x512xf32>
    %20 = math.exp %19 : vector<8x512xf32>
    %cst_12 = arith.constant 1.000000e+00 : f32
    %21 = vector.broadcast %cst_12 : f32 to vector<8x512xf32>
    %22 = arith.addf %21, %20 : vector<8x512xf32>
    %23 = arith.divf %21, %22 : vector<8x512xf32>
    %24 = arith.mulf %18, %23 : vector<8x512xf32>
    %25 = arith.truncf %24 : vector<8x512xf32> to vector<8x512xbf16>
    %c0_13 = arith.constant 0 : index
    %c0_14 = arith.constant 0 : index
    %c0_15 = arith.constant 0 : index
    %26 = vector.load %arg18[%c0_13, %c0_14, %c0_15] : memref<1x512x128xbf16, #tpu.memory_space<vmem>>, vector<1x512x128xbf16>
    %27 = vector.shape_cast %26 : vector<1x512x128xbf16> to vector<512x128xbf16>
    %cst_16 = arith.constant dense<0.000000e+00> : vector<8x128xf32>
    %28 = tpu.matmul %25, %27, %cst_16 {dimension_numbers = #tpu.dot_dimension_numbers<[1], [0], [0], [1], [0, 0, 1, 1], [], []>} : vector<8x512xbf16>, vector<512x128xbf16>, vector<8x128xf32> -> vector<8x128xf32>
    %c0_17 = arith.constant 0 : index
    %c0_18 = arith.constant 0 : index
    %c0_19 = arith.constant 0 : index
    %29 = vector.load %arg19[%c0_17, %c0_18, %c0_19] : memref<1x1x128xf32, #tpu.memory_space<vmem>>, vector<1x1x128xf32>
    %30 = vector.shape_cast %29 : vector<1x1x128xf32> to vector<1x128xf32>
    %31 = vector.broadcast %30 : vector<1x128xf32> to vector<8x128xf32>
    %32 = arith.addf %28, %31 : vector<8x128xf32>
    %c0_20 = arith.constant 0 : index
    %c0_21 = arith.constant 0 : index
    %c0_22 = arith.constant 0 : index
    %33 = vector.load %arg20[%c0_20, %c0_21, %c0_22] : memref<1x8x128xf32, #tpu.memory_space<vmem>>, vector<1x8x128xf32>
    %34 = vector.shape_cast %33 : vector<1x8x128xf32> to vector<8x128xf32>
    %35 = vector.broadcast %10 : vector<8x1xf32> to vector<8x128xf32>
    %36 = arith.mulf %35, %32 : vector<8x128xf32>
    %37 = arith.addf %34, %36 : vector<8x128xf32>
    %c0_23 = arith.constant 0 : index
    %c0_24 = arith.constant 0 : index
    %c0_25 = arith.constant 0 : index
    %38 = vector.load %arg20[%c0_23, %c0_24, %c0_25] : memref<1x8x128xf32, #tpu.memory_space<vmem>>, vector<1x8x128xf32>
    %39 = vector.shape_cast %38 : vector<1x8x128xf32> to vector<8x128xf32>
    %40 = vector.shape_cast %37 : vector<8x128xf32> to vector<1x8x128xf32>
    tpu.vector_store %arg20[%c0_23, %c0_24, %c0_25], %40 {strides = array<i32>} : memref<1x8x128xf32, #tpu.memory_space<vmem>>, vector<1x8x128xf32>,
    return
  }
  func.func @transform_0(%arg0: i32, %arg1: i32) -> (i32, i32, i32) {
    %c0_i32 = arith.constant 0 : i32
    %c0_i32_0 = arith.constant 0 : i32
    %c0_i32_1 = arith.constant 0 : i32
    return %arg0, %c0_i32, %c0_i32_0 : i32, i32, i32
  }
  func.func @transform_1(%arg0: i32, %arg1: i32) -> (i32, i32) {
    %c0_i32 = arith.constant 0 : i32
    %c0_i32_0 = arith.constant 0 : i32
    %c0_i32_1 = arith.constant 0 : i32
    return %c0_i32, %c0_i32_0 : i32, i32
  }
  func.func @transform_2(%arg0: i32, %arg1: i32) -> (i32, i32) {
    %c0_i32 = arith.constant 0 : i32
    %c0_i32_0 = arith.constant 0 : i32
    %c0_i32_1 = arith.constant 0 : i32
    return %c0_i32, %c0_i32_0 : i32, i32
  }
  func.func @transform_3(%arg0: i32, %arg1: i32) -> (i32, i32) {
    %c0_i32 = arith.constant 0 : i32
    %c0_i32_0 = arith.constant 0 : i32
    %c0_i32_1 = arith.constant 0 : i32
    return %c0_i32, %c0_i32_0 : i32, i32
  }
  func.func @transform_4(%arg0: i32, %arg1: i32) -> (i32, i32) {
    %c0_i32 = arith.constant 0 : i32
    %c0_i32_0 = arith.constant 0 : i32
    %c0_i32_1 = arith.constant 0 : i32
    return %c0_i32, %c0_i32_0 : i32, i32
  }
  func.func @transform_5(%arg0: i32, %arg1: i32) -> (i32, i32) {
    %c0_i32 = arith.constant 0 : i32
    %c0_i32_0 = arith.constant 0 : i32
    %c0_i32_1 = arith.constant 0 : i32
    return %c0_i32, %c0_i32_0 : i32, i32
  }
  func.func @transform_6(%arg0: i32, %arg1: i32) -> (i32, i32) {
    %c0_i32 = arith.constant 0 : i32
    %c0_i32_0 = arith.constant 0 : i32
    %c0_i32_1 = arith.constant 0 : i32
    return %c0_i32, %c0_i32_0 : i32, i32
  }
  func.func @transform_7(%arg0: i32, %arg1: i32) -> (i32, i32) {
    %c0_i32 = arith.constant 0 : i32
    %c0_i32_0 = arith.constant 0 : i32
    %c0_i32_1 = arith.constant 0 : i32
    return %c0_i32, %c0_i32_0 : i32, i32
  }
  func.func @transform_8(%arg0: i32, %arg1: i32) -> (i32, i32) {
    %c0_i32 = arith.constant 0 : i32
    %c0_i32_0 = arith.constant 0 : i32
    %c0_i32_1 = arith.constant 0 : i32
    return %c0_i32, %c0_i32_0 : i32, i32
  }
  func.func @transform_9(%arg0: i32, %arg1: i32) -> (i32, i32) {
    %c0_i32 = arith.constant 0 : i32
    %c0_i32_0 = arith.constant 0 : i32
    %c0_i32_1 = arith.constant 0 : i32
    return %c0_i32, %c0_i32_0 : i32, i32
  }
  func.func @transform_10(%arg0: i32, %arg1: i32) -> (i32, i32) {
    %c0_i32 = arith.constant 0 : i32
    %c0_i32_0 = arith.constant 0 : i32
    %c0_i32_1 = arith.constant 0 : i32
    return %c0_i32, %c0_i32_0 : i32, i32
  }
  func.func @transform_11(%arg0: i32, %arg1: i32) -> (i32, i32) {
    %c0_i32 = arith.constant 0 : i32
    %c0_i32_0 = arith.constant 0 : i32
    %c0_i32_1 = arith.constant 0 : i32
    return %c0_i32, %c0_i32_0 : i32, i32
  }
  func.func @transform_12(%arg0: i32, %arg1: i32) -> (i32, i32) {
    %c0_i32 = arith.constant 0 : i32
    %c0_i32_0 = arith.constant 0 : i32
    %c0_i32_1 = arith.constant 0 : i32
    return %c0_i32, %c0_i32_0 : i32, i32
  }
  func.func @transform_13(%arg0: i32, %arg1: i32) -> (i32, i32) {
    %c0_i32 = arith.constant 0 : i32
    %c0_i32_0 = arith.constant 0 : i32
    %c0_i32_1 = arith.constant 0 : i32
    return %c0_i32, %c0_i32_0 : i32, i32
  }
  func.func @transform_14(%arg0: i32, %arg1: i32) -> (i32, i32, i32) {
    %c0_i32 = arith.constant 0 : i32
    %c0_i32_0 = arith.constant 0 : i32
    %c0_i32_1 = arith.constant 0 : i32
    return %arg1, %c0_i32, %c0_i32_0 : i32, i32, i32
  }
  func.func @transform_15(%arg0: i32, %arg1: i32) -> (i32, i32, i32) {
    %c0_i32 = arith.constant 0 : i32
    %c0_i32_0 = arith.constant 0 : i32
    %c0_i32_1 = arith.constant 0 : i32
    return %arg1, %c0_i32, %c0_i32_0 : i32, i32, i32
  }
  func.func @transform_16(%arg0: i32, %arg1: i32) -> (i32, i32, i32) {
    %c0_i32 = arith.constant 0 : i32
    %c0_i32_0 = arith.constant 0 : i32
    %c0_i32_1 = arith.constant 0 : i32
    return %arg1, %c0_i32, %c0_i32_0 : i32, i32, i32
  }
  func.func @transform_17(%arg0: i32, %arg1: i32) -> (i32, i32, i32) {
    %c0_i32 = arith.constant 0 : i32
    %c0_i32_0 = arith.constant 0 : i32
    %c0_i32_1 = arith.constant 0 : i32
    return %arg1, %c0_i32, %c0_i32_0 : i32, i32, i32
  }
  func.func @transform_18(%arg0: i32, %arg1: i32) -> (i32, i32, i32) {
    %c0_i32 = arith.constant 0 : i32
    %c0_i32_0 = arith.constant 0 : i32
    %c0_i32_1 = arith.constant 0 : i32
    return %arg0, %c0_i32, %c0_i32_0 : i32, i32, i32
  }
}

</mosaic_0001>

<bundles_post_ra>
// kernel: tpu_custom_call.1
= control target key start
LH: loop header
LB: loop body
LE: loop exit
PB: predicated region body
PF: predicated region fallthrough
CT: control target
= control target key end

     0   :  { %s4994_s0 = inlined_call_operand.hbm [shape: f32[2,8,128], index: 0, kind: input, shape index: {}]   ;;  %s4995_s1 = inlined_call_operand.hbm [shape: f32[1,128], index: 1, kind: input, shape index: {}]   ;;  %s4996_s2 = inlined_call_operand.hbm [shape: f32[8,128], index: 2, kind: input, shape index: {}]   ;;  %s4997_s3 = inlined_call_operand.hbm [shape: f32[8,128], index: 3, kind: input, shape index: {}]   ;;  %s4998_s4 = inlined_call_operand.vmem [shape: bf16[128,128], index: 4, kind: input, shape index: {}]   ;;  %s4999_s5 = inlined_call_operand.hbm [shape: f32[1,128], index: 5, kind: input, shape index: {}]   ;;  %s5000_s6 = inlined_call_operand.vmem [shape: bf16[128,128], index: 6, kind: input, shape index: {}]   ;;  %s5001_s7 = inlined_call_operand.hbm [shape: f32[1,128], index: 7, kind: input, shape index: {}]   ;;  %s5002_s8 = inlined_call_operand.hbm [shape: bf16[128,128], index: 8, kind: input, shape index: {}]   ;;  %s5003_s9 = inlined_call_operand.hbm [shape: f32[1,128], index: 9, kind: input, shape index: {}]   ;;  %s5004_s10 = inlined_call_operand.hbm [shape: bf16[128,128], index: 10, kind: input, shape index: {}]   ;;  %s5005_s11 = inlined_call_operand.hbm [shape: f32[1,128], index: 11, kind: input, shape index: {}]   ;;  %s5006_s12 = inlined_call_operand.vmem [shape: f32[128,4], index: 12, kind: input, shape index: {}]   ;;  %s5007_s13 = inlined_call_operand.vmem [shape: f32[1,4], index: 13, kind: input, shape index: {}]   ;;  %s5008_s14 = inlined_call_operand.hbm [shape: bf16[4,128,512], index: 14, kind: input, shape index: {}]   ;;  %s5009_s15 = inlined_call_operand.vmem [shape: f32[4,1,512], index: 15, kind: input, shape index: {}]   ;;  %s5010_s16 = inlined_call_operand.hbm [shape: bf16[4,512,128], index: 16, kind: input, shape index: {}]   ;;  %s5011_s17 = inlined_call_operand.vmem [shape: f32[4,1,128], index: 17, kind: input, shape index: {}]   ;;  %s5012_s18 = inlined_call_operand.hbm [shape: f32[2,8,128], index: 18, kind: output, shape index: {}]  }
   0x1   :  { %5041 = sst [smem:[#allocation45_spill]] %s4994_s0 }
   0x2   :  { %5042 = sst [smem:[#allocation46_spill]] %s4995_s1 }
   0x3   :  { %5043 = sst [smem:[#allocation47_spill]] %s4996_s2 }
   0x4   :  { %5044 = sst [smem:[#allocation48_spill]] %s4997_s3 }
   0x5   :  { %5045 = sst [smem:[#allocation49_spill]] %s4998_s4 }
   0x6   :  { %5046 = sst [smem:[#allocation50_spill]] %s5000_s6 }
   0x7   :  { %5047 = sst [smem:[#allocation51_spill]] %s5001_s7 }
   0x8   :  { %5048 = sst [smem:[#allocation52_spill]] %s5006_s12 }
   0x9   :  { %5049 = sst [smem:[#allocation53_spill]] %s5007_s13 }
   0xa   :  { %5050 = sst [smem:[#allocation54_spill]] %s5009_s15 }
   0xb   :  { %5051 = sst [smem:[#allocation55_spill]] %s5011_s17 }
   0xc   :  { %5052 = sst [smem:[#allocation56_spill]] %s5012_s18 }
   0xd   :  { %23 = vsyncpa [#allocation5], 0 }
   0xe   :  { %25 = vsyncpa [#allocation5 + $0x1], 0 }
   0xf   :  { %26 = vsyncpa [#allocation8], 0 }
  0x10   :  { %27 = vsyncpa [#allocation11], 0 }
  0x11   :  { %28 = vsyncpa [#allocation14], 0 }
  0x12   :  { %29 = vsyncpa [#allocation17], 0 }
  0x13   :  { %30 = vsyncpa [#allocation20], 0 }
  0x14   :  { %31 = vsyncpa [#allocation6], 0 }
  0x15   :  { %33 = vsyncpa [#allocation6 + $0x1], 0  ;;  %s4261_s27 = smov 0   ;;  %s4263_s28 = smov 0  }
  0x16   :  { %s4265_s29 = smov 0   ;;  %s4267_s30 = smov 0  }
  0x17   :  { %s4269_s0 = smov 0   ;;  %s4271_s19 = smov 0  }
  0x18   :  { %s4273_s1 = smov 0   ;;  %s4275_s20 = smov 0  }
  0x19   :  { %s4277_s21 = smov 0   ;;  %s4279_s22 = smov 0  }
  0x1a   :  { %s4281_s2 = smov 0  }
  0x1b LB: > { %5053 = sst [smem:[#allocation32_spill]] %s4099_s28  ;;  %s4317_s23 = sadd.s32 4294967295, %s4135_s2   ;;  %s4135_s2 = sphi %s4281_s2, %s39_s2   ;;  %s4131_s22 = sphi %s4279_s22, %s5138_s22   ;;  %s4127_s21 = sphi %s4277_s21, %s5137_s21   ;;  %s4123_s20 = sphi %s4275_s20, %s5136_s20   ;;  %s4119_s1 = sphi %s4273_s1, %s5135_s1   ;;  %s4115_s19 = sphi %s4271_s19, %s5128_s19   ;;  %s4111_s0 = sphi %s4269_s0, %s5134_s0   ;;  %s4107_s30 = sphi %s4267_s30, %s5133_s30   ;;  %s4103_s29 = sphi %s4265_s29, %s5132_s29   ;;  %s4099_s28 = sphi %s4263_s28, %s5131_s28   ;;  %s4095_s27 = sphi %s4261_s27, %s5125_s27  }
  0x1c   : > { %5054 = sst [smem:[#allocation33_spill]] %s4107_s30  ;;  %s2860_s24 = sadd.s32 4294967294, %s4135_s2  }
  0x1d   : > { %5055 = sst [smem:[#allocation34_spill]] %s4115_s19  ;;  %s48_s25 = sadd.s32 1, %s4127_s21 }
  0x1e   : > { %5056 = sst [smem:[#allocation35_spill]] %s4119_s1  ;;  %s51_s26 = sadd.s32 1, %s4131_s22 }
  0x1f   : > { %5057 = sst [smem:[#allocation36_spill]] %s4123_s20  ;;  %p49_p0 = scmp.ge.s32.totalorder %s48_s25, 4 }
  0x20   : > { %s58_s18 = sadd.s32 1, %s4115_s19  ;;  %p5019_p1 = scmp.ne.s32.totalorder %s4115_s19, %s4111_s0 }
  0x21   : > { %p66_p2 = scmp.eq.s32.totalorder %s4135_s2, 0  ;;  %s5140_s25 = smov (%p49_p0, %s48_s25), 0 }
  0x22   : > { %5058 = sst [smem:[#allocation37_spill]] %s5140_s25  ;;  %s5142_s26 = smov (!%p49_p0, %s51_s26), %s4131_s22 }
  0x23   : > { %p4334_p3 = por %p66_p2, %p5019_p1  ;;  %p5018_p4 = scmp.ne.s32.totalorder %s4111_s0, %s4107_s30 }
  0x24   : > { %p53_p5 = scmp.ge.s32.totalorder %s5142_s26, 2  ;;  %p5020_p6 = scmp.eq.s32.totalorder %s4317_s23, 0 }
  0x25   : > { %s354_s13 = ssub.s32 %s4127_s21, %s5140_s25  ;;  %s357_s12 = sadd.s32 1, %s4103_s29 }
  0x26   : > { %s5144_s26 = smov (%p53_p5, %s5142_s26), 0  ;;  %p4351_p7 = por %p5020_p6, %p5018_p4 }
  0x27   : > { %5060 = sst [smem:[#allocation38_spill]] %s5144_s26  ;;  %p355_p8 = scmp.eq.s32.totalorder %s354_s13, 0 }
  0x28   : > { %s5061_s6 = scalar_select %p4351_p7, 1, 0 }
  0x29   : > { %s55_s4 = ssub.s32 %s4131_s22, %s5144_s26  ;;  %p364_p9 = scmp.ne.s32.totalorder %s4103_s29, %s4099_s28 }
  0x2a   : > { %5062 = sst [smem:[#allocation39_spill]] %s5061_s6  ;;  %p56_p10 = scmp.eq.s32.totalorder %s55_s4, 0 }
  0x2b   : > { %p370_p11 = scmp.ne.s32.totalorder %s4099_s28, %s4095_s27  ;;  %p4369_p12 = por %p364_p9, %p66_p2 }
  0x2c   : > { %s4362_s25 = scalar_select %p355_p8, %s4103_s29, %s357_s12  }
  0x2d   : > { %s4365_s15 = scalar_select %p56_p10, %s4115_s19, %s58_s18  }
  0x2e   : > { %5063 = sst [smem:[#allocation40_spill]] %s4362_s25  ;;  %p4375_p13 = por %p370_p11, %p5020_p6 }
  0x2f   : > { %5064 = sst [smem:[#allocation41_spill]] %s4365_s15  ;;  %p472_p0 = scmp.eq.s32.totalorder %s4317_s23, 7 }
  0x30   : > { %s5066_s13 = scalar_select %p4375_p13, 1, 0 }
  0x31   : > { %p478_p5 = scmp.eq.s32.totalorder %s2860_s24, 7  ;;  %p2861_p4 = scmp.ge.s32.totalorder %s4135_s2, 1 }
  0x32   : > { %5067 = sst [smem:[#allocation42_spill]] %s5066_s13  ;;  %p485_p1 = scmp.lt.s32.totalorder %s4135_s2, 9 }
  0x33   : > { %p5068_p8 = scmp.ne.s32.totalorder %s4115_s19, %s4111_s0  ;;  %p5071_p2 = scmp.ne.s32.totalorder %s4111_s0, %s4107_s30 }
  0x34   : > { %p4396_p11 = pnand %p2861_p4, %p485_p1  ;;  %p3392_p6 = scmp.lt.s32.totalorder %s4135_s2, 8 }
  0x35   : > { %p4385_p10 = por %p472_p0, %p5068_p8  ;;  %p4392_p9 = por %p478_p5, %p5071_p2 }
  0x36   : > { %s5074_s18 = scalar_select %p4396_p11, 1, 0 }
  0x37   : > { %s5069_s4 = scalar_select %p4385_p10, 1, 0 }
  0x38   : > { %s5072_s12 = scalar_select %p4392_p9, 1, 0 }
  0x39   : > { %5070 = sst [smem:[#allocation43_spill]] %s5069_s4  ;;  %p3341_p13 = pneg %p4396_p11 }
  0x3a   : > { %5073 = sst [smem:[#allocation44_spill]] %s5072_s12  ;;  %s613_s27 = sand.u32 1, %s4135_s2  }
  0x3b   : > { %s615_s24 = sand.u32 1, %s4115_s19   ;;  %p5075_p7 = scmp.eq.s32.totalorder %s4317_s23, 0 }
  0x3c   : > { %s2872_s15 = sshll.u32 %s615_s24, 3  ;;  %s2873_s25 = sshll.u32 %s4131_s22, 7 }
  0x3d   : > { %p4407_p0 = pnand %p3341_p13, %p5075_p7  ;;  %s5077_s12 = sld [smem:[#allocation45_spill]] }
  0x3e   : > { %s617_s13 = scalar_lea.vmem [#allocation4], %s2872_s15  ;;  %p4417_p1 = pnand %p3392_p6, %p4334_p3 }
  0x3f   : > { %s624_s28 = sshll.u32 %s617_s13, 4  ;;  %p4423_p4 = pnand %p3392_p6, %p4369_p12  ;;  %s625_s28 = int_to_ptr.vmem [resolvable:$true] %s624_s28 }
  0x40   : > { %s4427_s24 = scalar_lea.sflag [#allocation5], %s613_s27  ;;  %p3675_p7 = pneg %p4417_p1 }
  0x41   : > { %s5079_s19 = scalar_select %p4423_p4, 1, 0 }
  0x42   : > { %s3686_s30 = scalar_lea.vmem %s625_s28, 128  ;;  %s4137_s15 = smov [#allocation4]  }
  0x43   : > { %s622_s1 = scalar_lea.hbm %s5077_s12, %s2873_s25  ;;  %p3687_p13 = scmp.ne.s32.totalorder %s625_s28, %s3686_s30 }
  0x44   : > { %s3691_s20 = sshll.u32 %s4137_s15, 4  ;;  %s3692_s20 = int_to_ptr.vmem [resolvable:$false] %s3691_s20 }
  0x45   : > { %p3689_p5 = pnand %p3687_p13, %p3675_p7  ;;  %s3693_s25 = scalar_lea.vmem %s3692_s20, 256 }
  0x46   : > { %p3694_p3 = scmp.lt.s32.totalorder %s625_s28, %s3692_s20  ;;  %p3695_p2 = scmp.lt.s32.totalorder %s3693_s25, %s3686_s30 }
  0x47   : > { %p3690_p8 = pneg %p3689_p5 }
  0x48   : > { %p3696_p9 = por %p3695_p2, %p3694_p3 }
  0x4a   : > { %p3697_p10 = pnand %p3696_p9, %p3690_p8 }
  0x4c   : > { %3700 = shalt.err (!%p3697_p10)
}
  0x4d   : > { %3372 = dma.hbm_to_vmem [thread:$0]  (!%p4417_p1), %s622_s1, 128, %s625_s28, %s4427_s24  }
  0x4e   : > { %s4138_s17 = smov [#allocation7]   ;;  %s4139_s4 = smov [#allocation10]  }
  0x4f   : > { %s498_s13 = sshll.u32 %s4138_s17, 4  ;;  %s520_s12 = sshll.u32 %s4139_s4, 4  ;;  %s499_s13 = int_to_ptr.vmem [resolvable:$true] %s498_s13  ;;  %s521_s12 = int_to_ptr.vmem [resolvable:$true] %s520_s12 }
  0x50   : > { %p4436_p6 = pneg %p4407_p0  ;;  %s3712_s30 = scalar_lea.vmem %s499_s13, 16 }
  0x51   : > { %p3713_p12 = scmp.ne.s32.totalorder %s499_s13, %s3712_s30  ;;  %s3719_s6 = scalar_lea.vmem %s499_s13, 32 }
  0x52   : > { %p3720_p7 = scmp.lt.s32.totalorder %s499_s13, %s499_s13  ;;  %p3721_p1 = scmp.lt.s32.totalorder %s3719_s6, %s3712_s30 }
  0x53   : > { %p3715_p10 = pnand %p3713_p12, %p4436_p6 }
  0x54   : > { %p3722_p13 = por %p3721_p1, %p3720_p7 }
  0x55   : > { %p3716_p9 = pneg %p3715_p10 }
  0x57   : > { %p3723_p5 = pnand %p3722_p13, %p3716_p9 }
  0x59   : > { %3726 = shalt.err (!%p3723_p5)
}
  0x5a   : > { %s5081_s15 = sld [smem:[#allocation46_spill]]  ;;  %s3738_s20 = scalar_lea.vmem %s521_s12, 128 }
  0x5b   : > { %p3739_p8 = scmp.ne.s32.totalorder %s521_s12, %s3738_s20  ;;  %p3746_p12 = scmp.lt.s32.totalorder %s521_s12, %s521_s12 }
  0x5c   : > { %p3747_p10 = scmp.lt.s32.totalorder %s3738_s20, %s3738_s20 }
  0x5d   : > { %p3741_p3 = pnand %p3739_p8, %p4436_p6 }
  0x5e   : > { %p3748_p11 = por %p3747_p10, %p3746_p12 }
  0x5f   : > { %p3742_p2 = pneg %p3741_p3 }
  0x60   : > { %3344 = dma.hbm_to_vmem [thread:$0]  (!%p4407_p0), %s5081_s15, 16, %s499_s13, [#allocation8]  }
  0x61   : > { %p3749_p4 = pnand %p3748_p11, %p3742_p2 }
  0x63   : > { %3752 = shalt.err (!%p3749_p4)
}
  0x64   : > { %s5082_s3 = sld [smem:[#allocation48_spill]]  ;;  %s4140_s4 = smov [#allocation13]  }
  0x65   : > { %s548_s30 = sshll.u32 %s4140_s4, 4  ;;  %s4141_s13 = smov [#allocation16]   ;;  %s549_s30 = int_to_ptr.vmem [resolvable:$true] %s548_s30 }
  0x66   : > { %s572_s6 = sshll.u32 %s4141_s13, 4  ;;  %s3764_s28 = scalar_lea.vmem %s549_s30, 16  ;;  %s573_s6 = int_to_ptr.vmem [resolvable:$true] %s572_s6 }
  0x67   : > { %p3765_p9 = scmp.ne.s32.totalorder %s549_s30, %s3764_s28  ;;  %s3771_s1 = scalar_lea.vmem %s549_s30, 32 }
  0x68   : > { %p3772_p11 = scmp.lt.s32.totalorder %s549_s30, %s549_s30  ;;  %p3773_p4 = scmp.lt.s32.totalorder %s3771_s1, %s3764_s28 }
  0x69   : > { %p3767_p7 = pnand %p3765_p9, %p4436_p6 }
  0x6a   : > { %3350 = dma.hbm_to_vmem [thread:$0]  (!%p4407_p0), %s5082_s3, 128, %s521_s12, [#allocation11]  }
  0x6b   : > { %p3768_p1 = pneg %p3767_p7  ;;  %p3774_p13 = por %p3773_p4, %p3772_p11 }
  0x6d   : > { %p3775_p5 = pnand %p3774_p13, %p3768_p1 }
  0x6f   : > { %3778 = shalt.err (!%p3775_p5)
}
  0x70   : > { %s5083_s7 = sld [smem:[#allocation51_spill]]  ;;  %s3790_s20 = scalar_lea.vmem %s573_s6, 16 }
  0x71   : > { %p3791_p8 = scmp.ne.s32.totalorder %s573_s6, %s3790_s20  ;;  %s3797_s25 = scalar_lea.vmem %s573_s6, 32 }
  0x72   : > { %p3798_p12 = scmp.lt.s32.totalorder %s573_s6, %s573_s6  ;;  %p3799_p10 = scmp.lt.s32.totalorder %s3797_s25, %s3790_s20 }
  0x73   : > { %p3793_p3 = pnand %p3791_p8, %p4436_p6 }
  0x74   : > { %p3800_p9 = por %p3799_p10, %p3798_p12 }
  0x75   : > { %p3794_p2 = pneg %p3793_p3 }
  0x76   : > { %3356 = dma.hbm_to_vmem [thread:$0]  (!%p4407_p0), %s5083_s7, 16, %s549_s30, [#allocation14]  }
  0x77   : > { %p3801_p7 = pnand %p3800_p9, %p3794_p2 }
  0x79   : > { %3804 = shalt.err (!%p3801_p7)
}
  0x7a   : > { %3362 = dma.hbm_to_vmem [thread:$0]  (!%p4407_p0), %s5003_s9, 16, %s573_s6, [#allocation17]  }
  0x7b   : > { %s633_s30 = sand.u32 1, %s4103_s29   ;;  %s5038_s13 = sshll.u32 %s4127_s21, 12 }
  0x7c   : > { %s4470_s28 = sshll.u32 %s633_s30, 8  ;;  %s641_s15 = scalar_lea.hbm %s5008_s14, %s5038_s13 }
  0x7d   : > { %s635_s20 = scalar_lea.vmem [#allocation21], %s4470_s28  ;;  %p5084_p1 = scmp.ne.s32.totalorder %s5079_s19, 0 }
  0x7e   : > { %s642_s25 = sshll.u32 %s635_s20, 4  ;;  %s4142_s6 = smov [#allocation21]   ;;  %s643_s25 = int_to_ptr.vmem [resolvable:$true] %s642_s25 }
  0x7f   : > { %p5039_p11 = pneg %p5084_p1  ;;  %s3818_s17 = scalar_lea.vmem %s643_s25, 4096 }
  0x80   : > { %p3819_p4 = scmp.ne.s32.totalorder %s643_s25, %s3818_s17  ;;  %s3823_s4 = sshll.u32 %s4142_s6, 4  ;;  %s3824_s4 = int_to_ptr.vmem [resolvable:$false] %s3823_s4 }
  0x81   : > { %s3825_s30 = scalar_lea.vmem %s3824_s4, 8192  ;;  %p3826_p8 = scmp.lt.s32.totalorder %s643_s25, %s3824_s4 }
  0x82   : > { %p3821_p13 = pnand %p3819_p4, %p5039_p11  ;;  %p3827_p3 = scmp.lt.s32.totalorder %s3825_s30, %s3818_s17 }
  0x84   : > { %p3822_p5 = pneg %p3821_p13  ;;  %p3828_p2 = por %p3827_p3, %p3826_p8 }
  0x86   : > { %p3829_p12 = pnand %p3828_p2, %p3822_p5 }
  0x88   : > { %3832 = shalt.err (!%p3829_p12)
}
  0x89   : > { %s4143_s1 = smov 256   ;;  %s4144_s12 = smov 16  }
  0x8a   : > { %3375 = dma.hbm_to_vmem [thread:$0]  (!%p5084_p1), %s641_s15, 4096, %s643_s25, %s4427_s24, %s4143_s1, %s4143_s1, %s4144_s12  }
  0x8b   : > { %s4145_s20 = smov [#allocation9]   ;;  %s4146_s3 = smov [#allocation12]  }
  0x8c   : > { %s509_s13 = sshll.u32 %s4145_s20, 4  ;;  %s534_s7 = sshll.u32 %s4146_s3, 4  ;;  %s510_s13 = int_to_ptr.vmem [resolvable:$true] %s509_s13  ;;  %s535_s7 = int_to_ptr.vmem [resolvable:$true] %s534_s7 }
  0x8d   : > { %s3844_s6 = scalar_lea.vmem %s510_s13, 128  ;;  %p3852_p4 = scmp.lt.s32.totalorder %s510_s13, %s510_s13 }
  0x8e   : > { %p3845_p10 = scmp.ne.s32.totalorder %s510_s13, %s3844_s6  ;;  %p3853_p13 = scmp.lt.s32.totalorder %s3844_s6, %s3844_s6 }
  0x90   : > { %p3847_p9 = pnand %p3845_p10, %p4436_p6  ;;  %p3854_p5 = por %p3853_p13, %p3852_p4 }
  0x92   : > { %p3848_p7 = pneg %p3847_p9 }
  0x94   : > { %p3855_p8 = pnand %p3854_p5, %p3848_p7 }
  0x96   : > { %3858 = shalt.err (!%p3855_p8)
}
  0x97   : > { %s5085_s15 = sld [smem:[#allocation47_spill]]  ;;  %s3870_s25 = scalar_lea.vmem %s535_s7, 16 }
  0x98   : > { %p3871_p3 = scmp.ne.s32.totalorder %s535_s7, %s3870_s25  ;;  %s3877_s3 = scalar_lea.vmem %s535_s7, 32 }
  0x99   : > { %p3878_p10 = scmp.lt.s32.totalorder %s535_s7, %s535_s7  ;;  %p3879_p9 = scmp.lt.s32.totalorder %s3877_s3, %s3870_s25 }
  0x9a   : > { %p3873_p2 = pnand %p3871_p3, %p4436_p6 }
  0x9b   : > { %p3880_p11 = por %p3879_p9, %p3878_p10 }
  0x9c   : > { %p3874_p12 = pneg %p3873_p2 }
  0x9d   : > { %3347 = dma.hbm_to_vmem [thread:$0]  (!%p4407_p0), %s5085_s15, 128, %s510_s13, [#allocation8]  }
  0x9e   : > { %p3881_p4 = pnand %p3880_p11, %p3874_p12 }
  0xa0   : > { %3884 = shalt.err (!%p3881_p4)
}
  0xa1   : > { %3353 = dma.hbm_to_vmem [thread:$0]  (!%p4407_p0), %s4999_s5, 16, %s535_s7, [#allocation11]  }
  0xa2   : > { %s4147_s13 = smov [#allocation15]  }
  0xa3   : > { %s558_s12 = sshll.u32 %s4147_s13, 4  ;;  %s559_s12 = int_to_ptr.vmem [resolvable:$true] %s558_s12 }
  0xa4   : > { %s3896_s20 = scalar_lea.vmem %s559_s12, 1024  ;;  %p3904_p8 = scmp.lt.s32.totalorder %s559_s12, %s559_s12 }
  0xa5   : > { %p3897_p7 = scmp.ne.s32.totalorder %s559_s12, %s3896_s20  ;;  %p3905_p3 = scmp.lt.s32.totalorder %s3896_s20, %s3896_s20 }
  0xa7   : > { %p3899_p13 = pnand %p3897_p7, %p4436_p6  ;;  %p3906_p2 = por %p3905_p3, %p3904_p8 }
  0xa9   : > { %p3900_p5 = pneg %p3899_p13 }
  0xab   : > { %p3907_p11 = pnand %p3906_p2, %p3900_p5 }
  0xad   : > { %3910 = shalt.err (!%p3907_p11)
}
  0xae   : > { %s4148_s6 = smov 64   ;;  %s4149_s17 = smov 4  }
  0xaf   : > { %3359 = dma.hbm_to_vmem [thread:$0]  (!%p4407_p0), %s5002_s8, 1024, %s559_s12, [#allocation14], %s4148_s6, %s4148_s6, %s4149_s17  }
  0xb0   : > { %s4150_s15 = smov [#allocation18]   ;;  %s4151_s3 = smov [#allocation19]  }
  0xb1   : > { %s582_s25 = sshll.u32 %s4150_s15, 4  ;;  %s596_s30 = sshll.u32 %s4151_s3, 4  ;;  %s583_s25 = int_to_ptr.vmem [resolvable:$true] %s582_s25  ;;  %s597_s30 = int_to_ptr.vmem [resolvable:$true] %s596_s30 }
  0xb2   : > { %s3922_s1 = scalar_lea.vmem %s583_s25, 1024  ;;  %p3930_p4 = scmp.lt.s32.totalorder %s583_s25, %s583_s25 }
  0xb3   : > { %p3923_p12 = scmp.ne.s32.totalorder %s583_s25, %s3922_s1  ;;  %p3931_p7 = scmp.lt.s32.totalorder %s3922_s1, %s3922_s1 }
  0xb5   : > { %p3925_p10 = pnand %p3923_p12, %p4436_p6  ;;  %p3932_p13 = por %p3931_p7, %p3930_p4 }
  0xb7   : > { %p3926_p9 = pneg %p3925_p10 }
  0xb9   : > { %p3933_p5 = pnand %p3932_p13, %p3926_p9 }
  0xbb   : > { %3936 = shalt.err (!%p3933_p5)
}
  0xbc   : > { %3365 = dma.hbm_to_vmem [thread:$0]  (!%p4407_p0), %s5004_s10, 1024, %s583_s25, [#allocation17], %s4148_s6, %s4148_s6, %s4149_s17  }
  0xbd   : > { %s3948_s20 = scalar_lea.vmem %s597_s30, 16  ;;  %s3955_s7 = scalar_lea.vmem %s597_s30, 32 }
  0xbe   : > { %p3949_p8 = scmp.ne.s32.totalorder %s597_s30, %s3948_s20  ;;  %p3956_p11 = scmp.lt.s32.totalorder %s597_s30, %s597_s30 }
  0xbf   : > { %p3957_p12 = scmp.lt.s32.totalorder %s3955_s7, %s3948_s20 }
  0xc0   : > { %p3951_p3 = pnand %p3949_p8, %p4436_p6 }
  0xc1   : > { %p3958_p10 = por %p3957_p12, %p3956_p11 }
  0xc2   : > { %p3952_p2 = pneg %p3951_p3 }
  0xc4   : > { %p3959_p9 = pnand %p3958_p10, %p3952_p2 }
  0xc6   : > { %3962 = shalt.err (!%p3959_p9)
}
  0xc7   : > { %3368 = dma.hbm_to_vmem [thread:$0]  (!%p4407_p0), %s5005_s11, 16, %s597_s30, [#allocation20]  }
  0xc8   : > { %s5086_s25 = sshll.u32 %s4127_s21, 12  ;;  %s663_s13 = scalar_lea.vmem [#allocation22], %s4470_s28 }
  0xc9   : > { %s669_s1 = scalar_lea.hbm %s5010_s16, %s5086_s25  ;;  %s670_s12 = sshll.u32 %s663_s13, 4  ;;  %s671_s12 = int_to_ptr.vmem [resolvable:$true] %s670_s12 }
  0xca   : > { %s3976_s20 = scalar_lea.vmem %s671_s12, 4096  ;;  %p5087_p4 = pneg %p5084_p1 }
  0xcb   : > { %p3977_p6 = scmp.ne.s32.totalorder %s671_s12, %s3976_s20  ;;  %s4152_s26 = smov [#allocation22]  }
  0xcc   : > { %s3981_s7 = sshll.u32 %s4152_s26, 4  ;;  %s3982_s7 = int_to_ptr.vmem [resolvable:$false] %s3981_s7 }
  0xcd   : > { %p3979_p7 = pnand %p3977_p6, %p5087_p4  ;;  %s3983_s4 = scalar_lea.vmem %s3982_s7, 8192 }
  0xce   : > { %p3984_p5 = scmp.lt.s32.totalorder %s671_s12, %s3982_s7  ;;  %p3985_p0 = scmp.lt.s32.totalorder %s3983_s4, %s3976_s20 }
  0xcf   : > { %p3980_p13 = pneg %p3979_p7 }
  0xd0   : > { %p3986_p8 = por %p3985_p0, %p3984_p5 }
  0xd2   : > { %p3987_p3 = pnand %p3986_p8, %p3980_p13 }
  0xd4   : > { %3990 = shalt.err (!%p3987_p3)
}
  0xd5   : > { %3378 = dma.hbm_to_vmem [thread:$0]  (!%p5084_p1), %s669_s1, 4096, %s671_s12, %s4427_s24, %s4148_s6, %s4148_s6, %s4149_s17  }
  0xd6   : > { %p5088_p2 = scmp.ne.s32.totalorder %s5074_s18, 0 }
  0xd7   : > { %s5089_s28 = sld [smem:[#allocation39_spill]] (!%p5088_p2)  ;;  %s690_s30 = sand.u32 (!%p5088_p2), 1, %s4317_s23  }
  0xd8   : > { %688 = sbr.rel (%p5088_p2) target bundleno = 3496 (0xda8), region = 92  ;;  %s5040_s15 = sand.u32 (!%p5088_p2), 1, %s4111_s0  }
  0xd9   : > { %s4548_s25 = sshll.u32 (!%p5088_p2), %s5040_s15, 3  ;;  %s691_s3 = scalar_lea.sflag (!%p5088_p2), [#allocation5], %s690_s30 }
  0xda   : > { %s694_s19 = scalar_lea.vmem (!%p5088_p2), [#allocation4], %s4548_s25 }
  0xdd   : > { %p5090_p11 = scmp.ne.s32.totalorder %s5089_s28, 0 }
  0xdf   : > { %4062 = dma.done.wait (%p5090_p11), %s691_s3, 128  }
  0xe0   : > { %4064 = vsyncadd (%p5090_p11), %s691_s3, 4294967168  ;;  %p5091_p1 = scmp.eq.s32.totalorder %s4317_s23, 0 }
  0xe2   : > { %4066 = dma.done.wait (%p5091_p1), [#allocation8], 144   ;;  %p5092_p12 = pmov %p5091_p1 }
  0xe3   : > { %p5093_p10 = pmov %p5091_p1 }
  0xe4   : > { %4068 = vsyncadd (%p5092_p12), [#allocation8], 4294967152 }
  0xe5   : > { %4070 = dma.done.wait (%p5093_p10), [#allocation11], 144   ;;  %p5094_p9 = pmov %p5091_p1 }
  0xe6   : > { %p5095_p6 = pmov %p5091_p1 }
  0xe7   : > { %4072 = vsyncadd (%p5094_p9), [#allocation11], 4294967152 }
  0xe8   : > { %4074 = dma.done.wait (%p5095_p6), [#allocation14], 1040   ;;  %p5096_p4 = pmov %p5091_p1 }
  0xe9   : > { %p5097_p7 = pmov %p5091_p1 }
  0xea   : > { %4076 = vsyncadd (%p5096_p4), [#allocation14], 4294966256 }
  0xeb   : > { %4078 = dma.done.wait (%p5097_p7), [#allocation17], 1040   ;;  %p5098_p13 = pmov %p5091_p1 }
  0xec   : > { %p5099_p5 = pmov %p5091_p1 }
  0xed   : > { %4080 = vsyncadd (%p5098_p13), [#allocation17], 4294966256 }
  0xee   : > { %4082 = dma.done.wait (%p5099_p5), [#allocation20], 16   ;;  %p5100_p0 = pmov %p5091_p1 }
  0xef   : > { %s5101_s18 = sld [smem:[#allocation32_spill]] }
  0xf0   : > { %4084 = vsyncadd (%p5100_p0), [#allocation20], 4294967280  ;;  %s5102_s24 = sld [smem:[#allocation42_spill]] }
  0xf5   : > { %s737_s6 = sand.u32 1, %s5101_s18  }
  0xf6   : > { %s2891_s17 = sshll.u32 %s737_s6, 8  ;;  %p5103_p8 = scmp.ne.s32.totalorder %s5102_s24, 0 }
  0xf7   : > { %s4576_s27 = scalar_lea.vmem [#allocation21], %s2891_s17 }
  0xf8   : > { %4086 = dma.done.wait (%p5103_p8), %s691_s3, 8192  }
  0xf9   : > { %4088 = vsyncadd (%p5103_p8), %s691_s3, 4294959104  ;;  %s5104_s1 = sld [smem:[#allocation35_spill]]  ;;  %s4596_s24 = scalar_lea.vmem [#allocation22], %s2891_s17 }
  0xfa   : > { %s5105_s26 = sld [smem:[#allocation55_spill]]  ;;  %s4599_s3 = scalar_lea.vmem [#allocation23], %s4548_s25 }
  0xfb   : > { %s5106_s30 = sld [smem:[#allocation54_spill]] }
  0xff   : > { %p818_p3 = scmp.lt.s32.totalorder %s5104_s1, 3  ;;  %p2895_p2 = scmp.ne.s32.totalorder %s5104_s1, 0 }
 0x100   : > { %s5107_s20 = sld [smem:[#allocation49_spill]] (!%p2895_p2)  ;;  %s4155_s12 = smov (!%p2895_p2), 1  }
 0x101   : > { %s4584_s13 = scalar_select %p818_p3, %s5104_s1, 3 }
 0x102   : > { %829 = sbr.rel (%p2895_p2) target bundleno = 3010 (0xbc2), region = 144  ;;  %s5109_s28 = sld [smem:[#allocation50_spill]] (!%p2895_p2) }
 0x103   : > { %s2894_s23 = sshll.u32 %s4584_s13, 2  ;;  %s824_s7 = scalar_lea.vmem %s5105_s26, %s4584_s13 }
 0x104   : > { %s4594_s18 = scalar_lea.vmem %s5106_s30, %s2894_s23  ;;  %s4157_s4 = smov (!%p2895_p2), 96  }
 0x105   : > { %s4158_s23 = smov (!%p2895_p2), 64   ;;  %s5113_s17 = sld [smem:[#allocation52_spill]] (!%p2895_p2) }
 0x106   : > { %s5108_s26 = smov (!%p2895_p2), %s5107_s20  ;;  %s5114_s6 = sld [smem:[#allocation53_spill]] (!%p2895_p2) }
 0x107   : > { %v4602_v0 = vld [vmem:[%s694_s19] sm:$0xff]  ;;  %v4153_v4 = vmov 0.0   ;;  %v3527_v9 = vld [vmem:[%s5108_s26 + $0x20] sm:$0xff]   ;;  %vm4154_vm0 = vmmov 0   ;;  %v4676_v23 = vld [vmem:[#allocation7] ss:$0 sm:$0xff]  ;;  %v847_v26 = vlaneseq }
 0x108   : > { %v831_v1 = vmul.f32 %v4602_v0, %v4602_v0  ;;  %v3521_v2 = vld [vmem:[%s5107_s20 + $0x38] sm:$0xff]   ;;  %s5110_s15 = smov %s5109_s28  ;;  %3134 = vmatprep.subr.bf16.mxu0 %v4153_v4  ;;  %3154 = vmatprep.subr.bf16.mxu1 %v4153_v4  ;;  %v3523_v5 = vld [vmem:[%s5108_s26 + $0x30] sm:$0xff]   ;;  %v3525_v7 = vld [vmem:[%s5108_s26 + $0x28] sm:$0xff]   ;;  %s4156_s20 = smov 127   ;;  %vm1206_vm2 = vcmask 261120   ;;  %vm1270_vm3 = vcmask 1043456  }
 0x109   : > { %v3522_v3 = vld [vmem:[%s5109_s28 + $0x38] sm:$0xff]   ;;  %3135 = vmatpush3.bf16.msra.mxu0 %v3521_v2  ;;  %v3524_v6 = vld [vmem:[%s5110_s15 + $0x30] sm:$0xff]   ;;  %v3526_v8 = vld [vmem:[%s5110_s15 + $0x28] sm:$0xff]   ;;  %3150 = vmatprep.mubr.msk.bf16.mxu0 %vm4154_vm0, %v4153_v4  ;;  %v4681_v27 = vand.u32 127, %v847_v26  ;;  %vm1254_vm7 = vcmask 64512   ;;  %s4159_s28 = smov 32  }
 0x10a   : > { %832 = vadd.xlane.f32.xlu0 %v831_v1  ;;  %3155 = vmatpush3.bf16.msra.mxu1 %v3522_v3  ;;  %v3528_v10 = vld [vmem:[%s5110_s15 + $0x20] sm:$0xff]   ;;  %v3529_v11 = vld [vmem:[%s5108_s26 + $0x18] sm:$0xff]   ;;  %v3531_v13 = vld [vmem:[%s5108_s26 + $0x10] sm:$0xff]   ;;  %vm1663_vm8 = vcmask 523264   ;;  %vm1665_vm9 = vcmask 785408   ;;  %vm1914_vm10 = vcmask 31744  }
 0x10b   : > { %3136 = vmatprep.subr.bf16.mxu0 %v4153_v4  ;;  %3156 = vmatprep.subr.bf16.mxu1 %v4153_v4  ;;  %v3530_v12 = vld [vmem:[%s5110_s15 + $0x18] sm:$0xff]   ;;  %v3532_v14 = vld [vmem:[%s5110_s15 + $0x10] sm:$0xff]   ;;  %v3533_v15 = vld [vmem:[%s5108_s26 + $0x8] sm:$0xff]   ;;  %v849_v28 = vand.u32 1, %v4681_v27 }
 0x10c   : > { %v3534_v19 = vld [vmem:[%s5110_s15 + $0x8] sm:$0xff]   ;;  %v3535_v20 = vld [vmem:[%s5108_s26] sm:$0xff]   ;;  %3170 = vmatprep.mubr.msk.bf16.mxu1 %vm4154_vm0, %v4153_v4  ;;  %v3540_v41 = vld [vmem:[#allocation15 + $0x20] sm:$0xff]  }
 0x10d   : > { %3137 = vmatpush3.bf16.msra.mxu0 %v3523_v5  ;;  %v3536_v21 = vld [vmem:[%s5110_s15] sm:$0xff]   ;;  %vm850_vm1 = vcmp.eq.s32.totalorder %v849_v28, 0  ;;  %v3537_v37 = vld [vmem:[#allocation15 + $0x38] sm:$0xff]   ;;  %v3544_v45 = vld [vmem:[#allocation15] sm:$0xff]  }
 0x10e   : > { %3157 = vmatpush3.bf16.msra.mxu1 %v3524_v6  ;;  %3138 = vmatprep.subr.bf16.mxu0 %v4153_v4  ;;  %v858_v29 = vld [vmem:[#allocation10] sm:$0xff]  ;;  %v856_v30 = vld [vmem:[#allocation9] sm:$0xff]  ;;  %v2906_v47 = vld [vmem:[#allocation13] ss:$0 sm:$0xff] }
 0x10f   : > { %3158 = vmatprep.subr.bf16.mxu1 %v4153_v4  ;;  %v3538_v39 = vld [vmem:[#allocation15 + $0x30] sm:$0xff]   ;;  %v3539_v40 = vld [vmem:[#allocation15 + $0x28] sm:$0xff]   ;;  %v3541_v42 = vld [vmem:[#allocation15 + $0x18] sm:$0xff]  }
 0x110   : > { %v3542_v43 = vld [vmem:[#allocation15 + $0x10] sm:$0xff]   ;;  %v3543_v44 = vld [vmem:[#allocation15 + $0x8] sm:$0xff]   ;;  %v2897_v48 = vld [vmem:[#allocation12] ss:$0 sm:$0xff] }
 0x111   : > { %3139 = vmatpush3.bf16.msra.mxu0 %v3525_v7  ;;  %v2915_v63 = vld [vmem:[#allocation16] ss:$0 sm:$0xff] }
 0x112   : > { %3159 = vmatpush3.bf16.msra.mxu1 %v3526_v8  ;;  %3140 = vmatprep.subr.bf16.mxu0 %v4153_v4  ;;  %v1197_v8 = vshrl.u32 %v847_v26, 7 }
 0x113   : > { %3160 = vmatprep.subr.bf16.mxu1 %v4153_v4 }
 0x114   : > { %vm1198_vm4 = vcmp.gt.s32.totalorder %v4681_v27, %v1197_v8 }
 0x115   : > { %3141 = vmatpush3.bf16.msra.mxu0 %v3527_v9  ;;  %v1199_v9 = vadd.s32 4294967292, %v1197_v8 }
 0x116   : > { %3161 = vmatpush3.bf16.msra.mxu1 %v3528_v10  ;;  %3142 = vmatprep.subr.bf16.mxu0 %v4153_v4 }
 0x117   : > { %3162 = vmatprep.subr.bf16.mxu1 %v4153_v4  ;;  %vm1200_vm5 = vcmp.le.s32.totalorder %v4681_v27, %v1199_v9 }
 0x118   : > { %vm4711_vm6 = vmor %vm1198_vm4, %vm1200_vm5 }
 0x119   : > { %3143 = vmatpush3.bf16.msra.mxu0 %v3529_v11 }
 0x11a   : > { %3163 = vmatpush3.bf16.msra.mxu1 %v3530_v12  ;;  %3144 = vmatprep.subr.bf16.mxu0 %v4153_v4 }
 0x11b   : > { %3164 = vmatprep.subr.bf16.mxu1 %v4153_v4 }
 0x11d   : > { %3145 = vmatpush3.bf16.msra.mxu0 %v3531_v13 }
 0x11e   : > { %3165 = vmatpush3.bf16.msra.mxu1 %v3532_v14  ;;  %3146 = vmatprep.subr.bf16.mxu0 %v4153_v4 }
 0x11f   : > { %3166 = vmatprep.subr.bf16.mxu1 %v4153_v4 }
 0x121   : > { %3147 = vmatpush3.bf16.msra.mxu0 %v3533_v15 }
 0x122   : > { %3148 = vmatprep.subr.bf16.mxu0 %v4153_v4  ;;  %3167 = vmatpush3.bf16.msra.mxu1 %v3534_v19 }
 0x123   : > { %3168 = vmatprep.subr.bf16.mxu1 %v4153_v4 }
 0x125   : > { %3149 = vmatpush3.bf16.msra.mxu0 %v3535_v20 }
 0x126   : > { %3169 = vmatpush3.bf16.msra.mxu1 %v3536_v21  ;;  %3174 = vmatprep.subr.bf16.mxu0 %v4153_v4 }
 0x127   : > { %3194 = vmatprep.subr.bf16.mxu1 %v4153_v4 }
 0x193   : > { %v833_v16 = vpop.xlane.xlu0 %832 }
 0x194   : > { %v835_v17 = vmul.f32 0.0078125, %v833_v16 }
 0x196   : > { %v836_v18 = vadd.f32 1e-06, %v835_v17 }
 0x198   : > { %3553 = vrsqrt.f32 %v836_v18 }
 0x1a5   : > { %v3554_v22 = vpop.eup %3553 }
 0x1a6   : > { %v838_v24 = vmul.f32 %v3554_v22, %v4602_v0 }
 0x1a8   : > { %v846_v25 = vmul.f32 %v4676_v23, %v838_v24 }
 0x1aa   : > { %853 = vrot.lane.b32.xlu1 %v846_v25, %s4155_s12  ;;  %851 = vrot.lane.b32.xlu0 %v846_v25, %s4156_s20  ;;  %v857_v35 = vmul.f32 %v856_v30, %v846_v25  ;;  %v862_v46 = vpack.c.bf16 %v846_v25, %v846_v25 }
 0x21c   : > { %v854_v31 = vpop.permute.xlu1 %853  ;;  %v852_v32 = vpop.permute.xlu0 %851 }
 0x21d   : > { %v855_v33 = vsel %vm850_vm1, %v852_v32, %v854_v31 }
 0x21e   : > { %v859_v34 = vmul.f32 %v858_v29, %v855_v33 }
 0x220   : > { %v860_v36 = vadd.f32 %v859_v34, %v857_v35 }
 0x222   : > { %v861_v38 = vpack.c.bf16 %v860_v36, %v860_v36 }
 0x224   : > { %3151 = vmatmul.mubr.bf16.vlgmr.msra.gmra.mxu0 %v861_v38  ;;  %3171 = vmatmul.mubr.bf16.vlgmr.msra.gmra.mxu1 %v861_v38 }
 0x225   : > { %3175 = vmatpush3.bf16.msra.mxu0 %v3537_v37  ;;  %3190 = vmatprep.mubr.msk.bf16.mxu0 %vm4154_vm0, %v4153_v4 }
 0x226   : > { %3176 = vmatprep.subr.bf16.mxu0 %v4153_v4  ;;  %3196 = vmatprep.mubr.msk.bf16.mxu1 %vm4154_vm0, %v4153_v4 }
 0x229   : > { %3177 = vmatpush3.bf16.msra.mxu0 %v3538_v39 }
 0x22a   : > { %3178 = vmatprep.subr.bf16.mxu0 %v4153_v4 }
 0x22d   : > { %3179 = vmatpush3.bf16.msra.mxu0 %v3539_v40 }
 0x22e   : > { %3180 = vmatprep.subr.bf16.mxu0 %v4153_v4 }
 0x231   : > { %3181 = vmatpush3.bf16.msra.mxu0 %v3540_v41 }
 0x232   : > { %3182 = vmatprep.subr.bf16.mxu0 %v4153_v4 }
 0x235   : > { %3183 = vmatpush3.bf16.msra.mxu0 %v3541_v42 }
 0x236   : > { %3184 = vmatprep.subr.bf16.mxu0 %v4153_v4 }
 0x239   : > { %3185 = vmatpush3.bf16.msra.mxu0 %v3542_v43 }
 0x23a   : > { %3186 = vmatprep.subr.bf16.mxu0 %v4153_v4 }
 0x23d   : > { %3187 = vmatpush3.bf16.msra.mxu0 %v3543_v44 }
 0x23e   : > { %3188 = vmatprep.subr.bf16.mxu0 %v4153_v4 }
 0x241   : > { %3189 = vmatpush3.bf16.msra.mxu0 %v3544_v45 }
 0x242   : > { %3218 = vmatprep.subr.bf16.mxu0 %v4153_v4 }
 0x244   : > { %3191 = vmatmul.mubr.bf16.vlgmr.msra.gmra.mxu0 %v862_v46 }
 0x245   : > { %3220 = vmatprep.mubr.msk.bf16.mxu0 %vm4154_vm0, %v4153_v4 }
 0x2e4   : > { %v968_v49 = vpop.f32.mrf.mxu0  ;;  %v1079_v50 = vpop.f32.mrf.mxu1 }
 0x2e5   : > { %v1080_v51 = vadd.f32 %v2906_v47, %v1079_v50  ;;  %v969_v54 = vadd.f32 %v2897_v48, %v968_v49 }
 0x2e6   : > { %v3152_v52 = vpop.f32.mrf.mxu0  ;;  %v3172_v53 = vpop.f32.mrf.mxu1 }
 0x2e7   : > { %v1204_v55 = vpack.c.bf16 %v1080_v51, %v1080_v51  ;;  %v1202_v61 = vmul.f32 0.17677669, %v969_v54 }
 0x2e8   : > { %v971_v56 = vpop.f32.mrf.mxu0  ;;  %v1082_v57 = vpop.f32.mrf.mxu1 }
 0x2e9   : > { %v1211_v58 = vsel %vm1206_vm2, %v1204_v55, 0  ;;  %v1203_v62 = vpack.c.bf16 %v1202_v61, %v1202_v61 }
 0x2ea   : > { %v3153_v59 = vpop.f32.mrf.mxu0  ;;  %v3173_v60 = vpop.f32.mrf.mxu1  ;;  %3195 = vmatpush3.bf16.xpose.msra.mxu1 %v1211_v58 }
 0x2eb   : > { %3200 = vmatprep.subr.bf16.mxu1 %v4153_v4 }
 0x2f1   : > { %3197 = vmatmul.mubr.msk.bf16.vlgmr.msra.gmra.mxu1 %vm1206_vm2, %v1203_v62 }
 0x2f2   : > { %3202 = vmatprep.mubr.msk.bf16.mxu1 %vm4154_vm0, %v4153_v4 }
 0x304   : > { %v1190_v0 = vpop.f32.mrf.mxu0 }
 0x305   : > { %v1191_v1 = vadd.f32 %v2915_v63, %v1190_v0 }
 0x306   : > { %v3192_v2 = vpop.f32.mrf.mxu0 }
 0x307   : > { %v4703_v3 = vpack.c.bf16 %v1191_v1, %v1191_v1 }
 0x308   : > { %v1193_v5 = vpop.f32.mrf.mxu0 }
 0x309   : > { %v1272_v6 = vsel %vm1270_vm3, %v4703_v3, 0 }
 0x30a   : > { %v3193_v7 = vpop.f32.mrf.mxu0  ;;  %3201 = vmatpush3.bf16.msra.mxu1 %v1272_v6 }
 0x30b   : > { %3206 = vmatprep.subr.bf16.mxu1 %v4153_v4 }
 0x3b1   : > { %v1247_v11 = vpop.f32.mrf.mxu1 }
 0x3b2   : > { %v1253_v12 = vsel %vm4711_vm6, -inf, %v1247_v11 }
 0x3b3   : > { %v3198_v13 = vpop.f32.mrf.mxu1  ;;  %v1255_v14 = vsel %vm1254_vm7, %v1253_v12, -inf }
 0x3b4   : > { %1256 = vmax.xlane.f32.xlu1 %v1255_v14 }
 0x3b5   : > { %v1250_v15 = vpop.f32.mrf.mxu1 }
 0x3b7   : > { %v3199_v16 = vpop.f32.mrf.mxu1 }
 0x3c5   : > { %1318 = vrot.lane.b32.xlu1 %v1204_v55, %s4157_s4 }
 0x3c9   : > { %1430 = vrot.lane.b32.xlu1 %v1204_v55, %s4158_s23 }
 0x3cd   : > { %1428 = vrot.lane.b32.xlu1 %v1203_v62, %s4158_s23 }
 0x3d1   : > { %1541 = vrot.lane.b32.xlu1 %v1204_v55, %s4159_s28 }
 0x3d5   : > { %1539 = vrot.lane.b32.xlu1 %v1203_v62, %s4159_s28 }
 0x43d   : > { %v1257_v17 = vpop.xlane.xlu1 %1256 }
 0x43e   : > { %v1258_v18 = vsub.f32 %v1253_v12, %v1257_v17 }
 0x440   : > { %v1259_v19 = vmul.f32 1.442695, %v1258_v18 }
 0x441   : > { %v1319_v20 = vpop.permute.xlu1 %1318 }
 0x442   : > { %3555 = vpow2.f32 %v1259_v19  ;;  %v1324_v34 = vsel %vm1206_vm2, %v1319_v20, 0 }
 0x445   : > { %v1431_v21 = vpop.permute.xlu1 %1430 }
 0x446   : > { %v1436_v22 = vsel %vm1206_vm2, %v1431_v21, 0 }
 0x447   : > { %3219 = vmatpush3.bf16.xpose.msra.mxu0 %v1436_v22 }
 0x448   : > { %3230 = vmatprep.subr.bf16.mxu0 %v4153_v4 }
 0x449   : > { %v1429_v24 = vpop.permute.xlu1 %1428 }
 0x44d   : > { %v1542_v25 = vpop.permute.xlu1 %1541 }
 0x44e   : > { %v1547_v26 = vsel %vm1206_vm2, %v1542_v25, 0  ;;  %3221 = vmatmul.mubr.msk.bf16.vlgmr.msra.gmra.mxu0 %vm1206_vm2, %v1429_v24 }
 0x44f   : > { %v3556_v27 = vpop.eup %3555  ;;  %3231 = vmatpush3.bf16.xpose.msra.mxu0 %v1547_v26  ;;  %3232 = vmatprep.mubr.msk.bf16.mxu0 %vm4154_vm0, %v4153_v4 }
 0x450   : > { %v1261_v28 = vsel %vm1254_vm7, %v3556_v27, 0.0  ;;  %3242 = vmatprep.subr.bf16.mxu0 %v4153_v4 }
 0x451   : > { %1262 = vadd.xlane.f32.xlu0 %v1261_v28  ;;  %v1540_v29 = vpop.permute.xlu1 %1539 }
 0x456   : > { %3233 = vmatmul.mubr.msk.bf16.vlgmr.msra.gmra.mxu0 %vm1206_vm2, %v1540_v29  ;;  %v3545_v29 = vld [vmem:[#allocation18 + $0x38] sm:$0xff]  }
 0x457   : > { %3258 = vmatprep.mubr.msk.bf16.mxu0 %vm4154_vm0, %v4153_v4  ;;  %3243 = vmatpush3.bf16.msra.mxu0 %v3545_v29 }
 0x458   : > { %3244 = vmatprep.subr.bf16.mxu0 %v4153_v4 }
 0x467   : > { %1315 = vrot.lane.b32.xlu0 %v1203_v62, %s4157_s4 }
 0x4da   : > { %v1263_v30 = vpop.xlane.xlu0 %1262 }
 0x4db   : > { %3557 = vrcp.f32 %v1263_v30  ;;  %v3546_v30 = vld [vmem:[#allocation18 + $0x30] sm:$0xff]  }
 0x4dc   : > { %3245 = vmatpush3.bf16.msra.mxu0 %v3546_v30  ;;  %v4162_v30 = vmov 2  }
 0x4dd   : > { %3246 = vmatprep.subr.bf16.mxu0 %v4153_v4 }
 0x4de   : > { %v1316_v35 = vpop.permute.xlu0 %1315 }
 0x4e8   : > { %v3558_v31 = vpop.eup %3557 }
 0x4e9   : > { %v1265_v32 = vmul.f32 %v3558_v31, %v3556_v27  ;;  %v3547_v31 = vld [vmem:[#allocation18 + $0x28] sm:$0xff]  }
 0x4ea   : > { %3247 = vmatpush3.bf16.msra.mxu0 %v3547_v31  ;;  %v4163_v31 = vmov 3  }
 0x4eb   : > { %v1266_v33 = vpack.c.bf16 %v1265_v32, %v1265_v32  ;;  %3248 = vmatprep.subr.bf16.mxu0 %v4153_v4  ;;  %v3548_v32 = vld [vmem:[#allocation18 + $0x20] sm:$0xff]  }
 0x4ed   : > { %3203 = vmatmul.mubr.msk.bf16.vlgmr.msra.gmra.mxu1 %vm1254_vm7, %v1266_v33  ;;  %v3549_v33 = vld [vmem:[#allocation18 + $0x18] sm:$0xff]  }
 0x4ee   : > { %3207 = vmatpush3.bf16.xpose.msra.mxu1 %v1324_v34  ;;  %3208 = vmatprep.mubr.msk.bf16.mxu1 %vm4154_vm0, %v4153_v4  ;;  %v3550_v34 = vld [vmem:[#allocation18 + $0x10] sm:$0xff]  }
 0x4ef   : > { %3212 = vmatprep.subr.bf16.mxu1 %v4153_v4  ;;  %3249 = vmatpush3.bf16.msra.mxu0 %v3548_v32 }
 0x4f0   : > { %3250 = vmatprep.subr.bf16.mxu0 %v4153_v4 }
 0x4f3   : > { %3251 = vmatpush3.bf16.msra.mxu0 %v3549_v33 }
 0x4f4   : > { %3252 = vmatprep.subr.bf16.mxu0 %v4153_v4 }
 0x4f5   : > { %3209 = vmatmul.mubr.msk.bf16.vlgmr.msra.gmra.mxu1 %vm1206_vm2, %v1316_v35  ;;  %v3551_v35 = vld [vmem:[#allocation18 + $0x8] sm:$0xff]  }
 0x4f6   : > { %3214 = vmatprep.mubr.msk.bf16.mxu1 %vm4154_vm0, %v4153_v4 }
 0x4f7   : > { %3253 = vmatpush3.bf16.msra.mxu0 %v3550_v34 }
 0x4f8   : > { %3254 = vmatprep.subr.bf16.mxu0 %v4153_v4 }
 0x4fb   : > { %3255 = vmatpush3.bf16.msra.mxu0 %v3551_v35 }
 0x4fc   : > { %3256 = vmatprep.subr.bf16.mxu0 %v4153_v4 }
 0x50e   : > { %v1472_v36 = vpop.f32.mrf.mxu0 }
 0x50f   : > { %v1478_v37 = vsel %vm4711_vm6, -inf, %v1472_v36 }
 0x510   : > { %v3222_v38 = vpop.f32.mrf.mxu0  ;;  %v1479_v39 = vsel %vm1254_vm7, %v1478_v37, -inf }
 0x511   : > { %1480 = vmax.xlane.f32.xlu0 %v1479_v39  ;;  %v3552_v38 = vld [vmem:[#allocation18] sm:$0xff]  }
 0x512   : > { %v1475_v40 = vpop.f32.mrf.mxu0  ;;  %3257 = vmatpush3.bf16.msra.mxu0 %v3552_v38 }
 0x514   : > { %v3223_v41 = vpop.f32.mrf.mxu0 }
 0x516   : > { %v1583_v42 = vpop.f32.mrf.mxu0 }
 0x517   : > { %v1589_v57 = vsel %vm4711_vm6, -inf, %v1583_v42 }
 0x518   : > { %v3234_v43 = vpop.f32.mrf.mxu0  ;;  %v1590_v60 = vsel %vm1254_vm7, %v1589_v57, -inf }
 0x51a   : > { %v1586_v44 = vpop.f32.mrf.mxu0 }
 0x51c   : > { %v3235_v45 = vpop.f32.mrf.mxu0 }
 0x59a   : > { %v1481_v46 = vpop.xlane.xlu0 %1480 }
 0x59b   : > { %v1482_v47 = vsub.f32 %v1478_v37, %v1481_v46 }
 0x59d   : > { %v1483_v48 = vmul.f32 1.442695, %v1482_v47 }
 0x59f   : > { %3559 = vpow2.f32 %v1483_v48 }
 0x5ac   : > { %v3560_v61 = vpop.eup %3559 }
 0x5ad   : > { %v4746_v49 = vpop.f32.mrf.mxu1  ;;  %v1485_v62 = vsel %vm1254_vm7, %v3560_v61, 0.0 }
 0x5af   : > { %v3204_v50 = vpop.f32.mrf.mxu1 }
 0x5b1   : > { %v1311_v51 = vpop.f32.mrf.mxu1 }
 0x5b3   : > { %v3205_v52 = vpop.f32.mrf.mxu1 }
 0x5b5   : > { %v1360_v53 = vpop.f32.mrf.mxu1 }
 0x5b6   : > { %v1366_v54 = vsel %vm4711_vm6, -inf, %v1360_v53 }
 0x5b7   : > { %v3210_v55 = vpop.f32.mrf.mxu1  ;;  %v1367_v56 = vsel %vm1254_vm7, %v1366_v54, -inf }
 0x5b8   : > { %1368 = vmax.xlane.f32.xlu1 %v1367_v56 }
 0x5b9   : > { %v1363_v58 = vpop.f32.mrf.mxu1 }
 0x5ba   : > { %v1801_v58 = vld [vmem:[%s5113_s17 + $0x70] sm:$0xff] }
 0x5bb   : > { %v3211_v59 = vpop.f32.mrf.mxu1 }
 0x5bc   : > { %1591 = vmax.xlane.f32.xlu1 %v1590_v60  ;;  %v1799_v59 = vld [vmem:[%s5113_s17 + $0x60] sm:$0xff]  ;;  %v1798_v60 = vld [vmem:[%s5113_s17 + $0x58] sm:$0xff] }
 0x5c0   : > { %1486 = vadd.xlane.f32.xlu1 %v1485_v62 }
 0x5d1   : > { %1380 = vrot.lane.b32.xlu1 %v4703_v3, %s4157_s4 }
 0x5d5   : > { %1602 = vrot.lane.b32.xlu1 %v4703_v3, %s4159_s28 }
 0x641   : > { %v1369_v63 = vpop.xlane.xlu1 %1368 }
 0x642   : > { %v1370_v0 = vsub.f32 %v1366_v54, %v1369_v63 }
 0x644   : > { %v1371_v1 = vmul.f32 1.442695, %v1370_v0 }
 0x645   : > { %v1592_v2 = vpop.xlane.xlu1 %1591 }
 0x646   : > { %3561 = vpow2.f32 %v1371_v1  ;;  %v1593_v5 = vsub.f32 %v1589_v57, %v1592_v2  ;;  %v1802_v57 = vld [vmem:[%s5113_s17 + $0x78] sm:$0xff] }
 0x648   : > { %v1594_v6 = vmul.f32 1.442695, %v1593_v5 }
 0x649   : > { %v1487_v7 = vpop.xlane.xlu1 %1486 }
 0x64a   : > { %3563 = vpow2.f32 %v1594_v6  ;;  %v1797_v6 = vld [vmem:[%s5113_s17 + $0x50] sm:$0xff] }
 0x64d   : > { %v1381_v8 = vpop.permute.xlu1 %1380 }
 0x64e   : > { %v1386_v9 = vsel %vm1270_vm3, %v1381_v8, 0  ;;  %v1795_v8 = vld [vmem:[%s5113_s17 + $0x40] sm:$0xff] }
 0x64f   : > { %3213 = vmatpush3.bf16.msra.mxu1 %v1386_v9  ;;  %v1794_v9 = vld [vmem:[%s5113_s17 + $0x38] sm:$0xff] }
 0x650   : > { %3224 = vmatprep.subr.bf16.mxu1 %v4153_v4 }
 0x651   : > { %v1603_v22 = vpop.permute.xlu1 %1602 }
 0x652   : > { %v1608_v26 = vsel %vm1270_vm3, %v1603_v22, 0 }
 0x653   : > { %v3562_v10 = vpop.eup %3561 }
 0x654   : > { %v1373_v11 = vsel %vm1254_vm7, %v3562_v10, 0.0 }
 0x655   : > { %1374 = vadd.xlane.f32.xlu0 %v1373_v11  ;;  %v1792_v11 = vld [vmem:[%s5113_s17 + $0x28] sm:$0xff] }
 0x657   : > { %v3564_v12 = vpop.eup %3563 }
 0x658   : > { %v1596_v13 = vsel %vm1254_vm7, %v3564_v12, 0.0 }
 0x659   : > { %1597 = vadd.xlane.f32.xlu0 %v1596_v13  ;;  %v1790_v13 = vld [vmem:[%s5113_s17 + $0x18] sm:$0xff] }
 0x66f   : > { %1491 = vrot.lane.b32.xlu0 %v4703_v3, %s4158_s23 }
 0x6de   : > { %v1375_v14 = vpop.xlane.xlu0 %1374 }
 0x6df   : > { %3565 = vrcp.f32 %v1375_v14  ;;  %v1789_v14 = vld [vmem:[%s5113_s17 + $0x10] sm:$0xff] }
 0x6e0   : > { %3567 = vrcp.f32 %v1487_v7  ;;  %v1796_v7 = vld [vmem:[%s5113_s17 + $0x48] sm:$0xff] }
 0x6e2   : > { %v1598_v15 = vpop.xlane.xlu0 %1597 }
 0x6e3   : > { %3569 = vrcp.f32 %v1598_v15  ;;  %v1788_v15 = vld [vmem:[%s5113_s17 + $0x8] sm:$0xff] }
 0x6e6   : > { %v1492_v18 = vpop.permute.xlu0 %1491 }
 0x6e7   : > { %v1497_v21 = vsel %vm1270_vm3, %v1492_v18, 0 }
 0x6ec   : > { %v3566_v16 = vpop.eup %3565 }
 0x6ed   : > { %v1377_v17 = vmul.f32 %v3566_v16, %v3562_v10  ;;  %v3568_v20 = vpop.eup %3567  ;;  %v1793_v10 = vld [vmem:[%s5113_s17 + $0x30] sm:$0xff]  ;;  %v1787_v16 = vld [vmem:[%s5113_s17] sm:$0xff] }
 0x6ee   : > { %v1489_v3 = vmul.f32 %v3568_v20, %v3560_v61  ;;  %v2932_v61 = vld [vmem:[#allocation19] ss:$0 sm:$0xff] }
 0x6ef   : > { %v1378_v19 = vpack.c.bf16 %v1377_v17, %v1377_v17 }
 0x6f0   : > { %v1490_v24 = vpack.c.bf16 %v1489_v3, %v1489_v3  ;;  %v3570_v25 = vpop.eup %3569 }
 0x6f1   : > { %3215 = vmatmul.mubr.msk.bf16.vlgmr.msra.gmra.mxu1 %vm1254_vm7, %v1378_v19  ;;  %v1600_v27 = vmul.f32 %v3570_v25, %v3564_v12  ;;  %v1791_v12 = vld [vmem:[%s5113_s17 + $0x20] sm:$0xff]  ;;  %v4161_v25 = vmov 0  }
 0x6f2   : > { %3225 = vmatpush3.bf16.msra.mxu1 %v1497_v21  ;;  %3226 = vmatprep.mubr.msk.bf16.mxu1 %vm4154_vm0, %v4153_v4 }
 0x6f3   : > { %3236 = vmatprep.subr.bf16.mxu1 %v4153_v4  ;;  %v1601_v28 = vpack.c.bf16 %v1600_v27, %v1600_v27  ;;  %3516 = vset.pattern.permute.xlu0 %v4161_v25 }
 0x6f9   : > { %3227 = vmatmul.mubr.msk.bf16.vlgmr.msra.gmra.mxu1 %vm1254_vm7, %v1490_v24  ;;  %v4160_v24 = vmov 1  }
 0x6fa   : > { %3237 = vmatpush3.bf16.msra.mxu1 %v1608_v26  ;;  %3238 = vmatprep.mubr.msk.bf16.mxu1 %vm4154_vm0, %v4153_v4  ;;  %v2941_v26 = vld [vmem:[%s5114_s6] ss:$0 sm:$0xff] }
 0x6fb   : > { %3262 = vmatprep.subr.mxu1 %v4153_v4  ;;  %3517 = vset.pattern.permute.xlu1 %v4160_v24 }
 0x701   : > { %3239 = vmatmul.mubr.msk.bf16.vlgmr.msra.gmra.mxu1 %vm1254_vm7, %v1601_v28 }
 0x702   : > { %3294 = vmatprep.mubr.msk.f32.mxu1 %vm4154_vm0, %v4153_v4  ;;  %3263 = vmatpush3.msra.mxu1 %v1802_v57 }
 0x703   : > { %3264 = vmatprep.subr.mxu1 %v4153_v4 }
 0x704   : > { %3265 = vmatpush3.msra.mxu1 %v1801_v58 }
 0x705   : > { %3266 = vmatprep.subr.mxu1 %v4153_v4 }
 0x7b1   : > { %v1422_v36 = vpop.f32.mrf.mxu1 }
 0x7b2   : > { %1651 = vrot.lane.b32.xlu1 %v1422_v36, %s4159_s28 }
 0x7b3   : > { %v3216_v37 = vpop.f32.mrf.mxu1 }
 0x7b5   : > { %v1425_v39 = vpop.f32.mrf.mxu1 }
 0x7b7   : > { %v3217_v40 = vpop.f32.mrf.mxu1 }
 0x7b9   : > { %v1533_v41 = vpop.f32.mrf.mxu1 }
 0x7ba   : > { %1655 = vrot.lane.b32.xlu0 %v1533_v41, %s4158_s23 }
 0x7bb   : > { %v3228_v42 = vpop.f32.mrf.mxu1 }
 0x7bd   : > { %v1536_v43 = vpop.f32.mrf.mxu1 }
 0x7bf   : > { %v3229_v44 = vpop.f32.mrf.mxu1 }
 0x7c1   : > { %v1644_v45 = vpop.f32.mrf.mxu1 }
 0x7c2   : > { %1659 = vrot.lane.b32.xlu1 %v1644_v45, %s4157_s4 }
 0x7c3   : > { %v3240_v46 = vpop.f32.mrf.mxu1 }
 0x7c5   : > { %v1647_v47 = vpop.f32.mrf.mxu1 }
 0x7c7   : > { %v3241_v48 = vpop.f32.mrf.mxu1 }
 0x824   : > { %v1652_v50 = vpop.permute.xlu1 %1651 }
 0x825   : > { %v1662_v52 = vsel %vm1206_vm2, %v4746_v49, %v1652_v50  ;;  %v1800_v49 = vld [vmem:[%s5113_s17 + $0x68] sm:$0xff] }
 0x826   : > { %3267 = vmatpush3.msra.mxu1 %v1800_v49 }
 0x827   : > { %3268 = vmatprep.subr.mxu1 %v4153_v4 }
 0x828   : > { %3269 = vmatpush3.msra.mxu1 %v1799_v59 }
 0x829   : > { %3270 = vmatprep.subr.mxu1 %v4153_v4 }
 0x82a   : > { %3271 = vmatpush3.msra.mxu1 %v1798_v60 }
 0x82b   : > { %3272 = vmatprep.subr.mxu1 %v4153_v4 }
 0x82c   : > { %v1656_v51 = vpop.permute.xlu0 %1655  ;;  %3273 = vmatpush3.msra.mxu1 %v1797_v6 }
 0x82d   : > { %v1664_v53 = vsel %vm1663_vm8, %v1662_v52, %v1656_v51  ;;  %3274 = vmatprep.subr.mxu1 %v4153_v4 }
 0x82e   : > { %3275 = vmatpush3.msra.mxu1 %v1796_v7 }
 0x82f   : > { %3276 = vmatprep.subr.mxu1 %v4153_v4 }
 0x830   : > { %3277 = vmatpush3.msra.mxu1 %v1795_v8 }
 0x831   : > { %3278 = vmatprep.subr.mxu1 %v4153_v4 }
 0x832   : > { %3279 = vmatpush3.msra.mxu1 %v1794_v9 }
 0x833   : > { %3280 = vmatprep.subr.mxu1 %v4153_v4 }
 0x834   : > { %v1660_v54 = vpop.permute.xlu1 %1659  ;;  %3281 = vmatpush3.msra.mxu1 %v1793_v10 }
 0x835   : > { %v1666_v55 = vsel %vm1665_vm9, %v1664_v53, %v1660_v54  ;;  %3282 = vmatprep.subr.mxu1 %v4153_v4 }
 0x836   : > { %v1667_v56 = vpack.c.bf16 %v1666_v55, %v1666_v55  ;;  %3283 = vmatpush3.msra.mxu1 %v1792_v11 }
 0x837   : > { %3284 = vmatprep.subr.mxu1 %v4153_v4 }
 0x838   : > { %3259 = vmatmul.mubr.bf16.vlgmr.msra.gmra.mxu0 %v1667_v56  ;;  %3285 = vmatpush3.msra.mxu1 %v1791_v12 }
 0x839   : > { %3286 = vmatprep.subr.mxu1 %v4153_v4 }
 0x83a   : > { %3287 = vmatpush3.msra.mxu1 %v1790_v13 }
 0x83b   : > { %3288 = vmatprep.subr.mxu1 %v4153_v4 }
 0x83c   : > { %3289 = vmatpush3.msra.mxu1 %v1789_v14 }
 0x83d   : > { %3290 = vmatprep.subr.mxu1 %v4153_v4 }
 0x83e   : > { %3291 = vmatpush3.msra.mxu1 %v1788_v15 }
 0x83f   : > { %3292 = vmatprep.subr.mxu1 %v4153_v4 }
 0x840   : > { %3293 = vmatpush3.msra.mxu1 %v1787_v16 }
 0x8f8   : > { %v1773_v62 = vpop.f32.mrf.mxu0 }
 0x8f9   : > { %v1774_v63 = vadd.f32 %v2932_v61, %v1773_v62 }
 0x8fa   : > { %v3260_v0 = vpop.f32.mrf.mxu0 }
 0x8fb   : > { %1930 = vst [vmem:[%s4599_s3] sm:$0xff] %v1774_v63  ;;  %v1779_v1 = vmul.f32 %v1774_v63, %v1774_v63 }
 0x8fc   : > { %v1776_v2 = vpop.f32.mrf.mxu0 }
 0x8fd   : > { %1780 = vadd.xlane.f32.xlu0 %v1779_v1 }
 0x8fe   : > { %v3261_v5 = vpop.f32.mrf.mxu0 }
 0x986   : > { %v1781_v17 = vpop.xlane.xlu0 %1780 }
 0x987   : > { %v1782_v18 = vmul.f32 0.0078125, %v1781_v17 }
 0x989   : > { %v1783_v19 = vadd.f32 1e-06, %v1782_v18 }
 0x98b   : > { %3571 = vrsqrt.f32 %v1783_v19 }
 0x998   : > { %v3572_v20 = vpop.eup %3571 }
 0x999   : > { %v1785_v21 = vmul.f32 %v3572_v20, %v1774_v63 }
 0x99b   : > { %v1786_v3 = vmul.f32 %v4676_v23, %v1785_v21 }
 0x99d   : > { %3295 = vmatmul.mubr.f32.vlgmr.msra.gmra.mxu1 %v1786_v3  ;;  %v1927_v22 = vpack.c.bf16 %v1786_v3, %v1786_v3 }
 0x99f   : > { %1928 = vst [vmem:[#allocation2] sm:$0xf] %v1927_v22 }
 0xa5d   : > { %v1876_v27 = vpop.f32.mrf.mxu1 }
 0xa5e   : > { %v1877_v28 = vadd.f32 %v2941_v26, %v1876_v27 }
 0xa5f   : > { %v3296_v29 = vpop.f32.mrf.mxu1 }
 0xa60   : > { %1890 = vperm.xlu1 %3517, %v1877_v28   ;;  %1882 = vperm.xlu0 %3516, %v1877_v28   ;;  %v1915_v23 = vsel %vm1914_vm10, %v1877_v28, -inf }
 0xa64   : > { %3518 = vset.pattern.permute.xlu1 %v4162_v30  ;;  %3520 = vset.pattern.permute.xlu0 %v4163_v31 }
 0xa65   : > { %1898 = vperm.xlu1 %3518, %v1877_v28  }
 0xa69   : > { %3519 = vset.pattern.permute.xlu1 %v4163_v31 }
 0xa89   : > { %1916 = vmax.xlane.f32.xlu1 %v1915_v23 }
 0xa9a   : > { %1906 = vperm.xlu1 %3519, %v1877_v28  }
 0xadb   : > { %v1891_v32 = vpop.permute.xlu1 %1890  ;;  %v1883_v35 = vpop.permute.xlu0 %1882 }
 0xadc   : > { %vm1893_vm11 = vcmp.gt.f32.partialorder %v1891_v32, %v1877_v28  ;;  %vm1885_vm12 = vcmp.gt.f32.partialorder %v1883_v35, %v1877_v28 }
 0xadd   : > { %v2943_v39 = vsel %vm1893_vm11, 1.0, %v4153_v4  ;;  %v2942_v40 = vsel %vm1885_vm12, 1.0, %v4153_v4 }
 0xade   : > { %v1896_v42 = vadd.f32 %v2943_v39, %v2942_v40 }
 0xae0   : > { %v1899_v33 = vpop.permute.xlu1 %1898 }
 0xae1   : > { %vm1901_vm13 = vcmp.gt.f32.partialorder %v1899_v33, %v1877_v28 }
 0xae2   : > { %v2944_v41 = vsel %vm1901_vm13, 1.0, %v4153_v4 }
 0xae3   : > { %v1904_v44 = vadd.f32 %v2944_v41, %v1896_v42 }
 0xb12   : > { %v1917_v34 = vpop.xlane.xlu1 %1916 }
 0xb13   : > { %v1918_v36 = vsub.f32 %v1877_v28, %v1917_v34 }
 0xb15   : > { %v1919_v37 = vmul.f32 1.442695, %v1918_v36 }
 0xb16   : > { %v1907_v38 = vpop.permute.xlu1 %1906 }
 0xb17   : > { %3573 = vpow2.f32 %v1919_v37  ;;  %vm1909_vm14 = vcmp.gt.f32.partialorder %v1907_v38, %v1877_v28 }
 0xb18   : > { %v2945_v43 = vsel %vm1909_vm14, 1.0, %v4153_v4 }
 0xb19   : > { %v1912_v45 = vadd.f32 %v2945_v43, %v1904_v44 }
 0xb1b   : > { %vm1913_vm15 = vcmp.lt.f32.partialorder %v1912_v45, 2.0 }
 0xb24   : > { %v3574_v46 = vpop.eup %3573 }
 0xb25   : > { %v1921_v47 = vsel %vm1913_vm15, %v3574_v46, 0.0 }
 0xb26   : > { %v1922_v48 = vsel %vm1914_vm10, %v1921_v47, 0.0 }
 0xb27   : > { %1923 = vadd.xlane.f32.xlu1 %v1922_v48 }
 0xbb0   : > { %v1924_v50 = vpop.xlane.xlu1 %1923 }
 0xbb1   : > { %3575 = vrcp.f32 %v1924_v50 }
 0xbbe   : > { %v3576_v51 = vpop.eup %3575 }
 0xbbf   : > { %v1926_v52 = vmul.f32 %v3576_v51, %v1921_v47 }
 0xbc1   : > { %1929 = vst.msk [vmem:[#allocation3] sm:$0xff] %vm1914_vm10, %v1926_v52 }
 0xbc2 PF: > { %v3577_v4 = vld [vmem:[%s4576_s27 + $0xe4] ss:$16 sps:$4 sm:$0xff]   ;;  %v3579_v53 = vld [vmem:[%s4576_s27 + $0xec] ss:$16 sps:$4 sm:$0xff]   ;;  %v4164_v54 = vmov 0   ;;  %vm1937_vm0 = vcmask 31744  }
 0xbc3   : > { %2188 = vmatprep.mubr.bf16.mxu0 %v4164_v54  ;;  %2229 = vmatprep.mubr.bf16.mxu1 %v4164_v54  ;;  %v3581_v55 = vld [vmem:[%s4576_s27 + $0xe0] ss:$16 sps:$4 sm:$0xff]   ;;  %v3582_v56 = vld [vmem:[%s4576_s27 + $0xe8] ss:$16 sps:$4 sm:$0xff]   ;;  %v3583_v57 = vld [vmem:[%s4576_s27 + $0xc4] ss:$16 sps:$4 sm:$0xff]   ;;  %v1931_v54 = vlaneseq }
 0xbc4   : > { %2156 = vmatprep.subr.bf16.mxu0 %v3577_v4  ;;  %2197 = vmatprep.subr.bf16.mxu1 %v3579_v53  ;;  %v3585_v58 = vld [vmem:[%s4576_s27 + $0xcc] ss:$16 sps:$4 sm:$0xff]   ;;  %v3587_v49 = vld [vmem:[%s4576_s27 + $0xc0] ss:$16 sps:$4 sm:$0xff]   ;;  %v3588_v59 = vld [vmem:[%s4576_s27 + $0xc8] ss:$16 sps:$4 sm:$0xff]  }
 0xbc5   : > { %2157 = vmatpush1.bf16.msra.mxu0 %v3581_v55  ;;  %2198 = vmatpush1.bf16.msra.mxu1 %v3582_v56  ;;  %v3589_v60 = vld [vmem:[%s4576_s27 + $0xa4] ss:$16 sps:$4 sm:$0xff]   ;;  %v3591_v61 = vld [vmem:[%s4576_s27 + $0xac] ss:$16 sps:$4 sm:$0xff]   ;;  %v3593_v62 = vld [vmem:[%s4576_s27 + $0xa0] ss:$16 sps:$4 sm:$0xff]  }
 0xbc6   : > { %2158 = vmatprep.subr.bf16.mxu0 %v3583_v57  ;;  %2199 = vmatprep.subr.bf16.mxu1 %v3585_v58  ;;  %v3594_v63 = vld [vmem:[%s4576_s27 + $0xa8] ss:$16 sps:$4 sm:$0xff]   ;;  %v3595_v0 = vld [vmem:[%s4576_s27 + $0x84] ss:$16 sps:$4 sm:$0xff]   ;;  %v3597_v1 = vld [vmem:[%s4576_s27 + $0x8c] ss:$16 sps:$4 sm:$0xff]  }
 0xbc7   : > { %v3599_v2 = vld [vmem:[%s4576_s27 + $0x80] ss:$16 sps:$4 sm:$0xff]   ;;  %v3600_v5 = vld [vmem:[%s4576_s27 + $0x88] ss:$16 sps:$4 sm:$0xff]   ;;  %v3601_v6 = vld [vmem:[%s4576_s27 + $0x64] ss:$16 sps:$4 sm:$0xff]  }
 0xbc8   : > { %v3603_v7 = vld [vmem:[%s4576_s27 + $0x6c] ss:$16 sps:$4 sm:$0xff]   ;;  %v3605_v8 = vld [vmem:[%s4576_s27 + $0x60] ss:$16 sps:$4 sm:$0xff]   ;;  %v3606_v9 = vld [vmem:[%s4576_s27 + $0x68] ss:$16 sps:$4 sm:$0xff]  }
 0xbc9   : > { %2159 = vmatpush1.bf16.msra.mxu0 %v3587_v49  ;;  %2200 = vmatpush1.bf16.msra.mxu1 %v3588_v59  ;;  %v3607_v10 = vld [vmem:[%s4576_s27 + $0x44] ss:$16 sps:$4 sm:$0xff]   ;;  %v3609_v11 = vld [vmem:[%s4576_s27 + $0x4c] ss:$16 sps:$4 sm:$0xff]   ;;  %v3611_v12 = vld [vmem:[%s4576_s27 + $0x40] ss:$16 sps:$4 sm:$0xff]  }
 0xbca   : > { %2160 = vmatprep.subr.bf16.mxu0 %v3589_v60  ;;  %2201 = vmatprep.subr.bf16.mxu1 %v3591_v61  ;;  %v3612_v13 = vld [vmem:[%s4576_s27 + $0x48] ss:$16 sps:$4 sm:$0xff]   ;;  %v3613_v14 = vld [vmem:[%s4576_s27 + $0x24] ss:$16 sps:$4 sm:$0xff]   ;;  %v3615_v15 = vld [vmem:[%s4576_s27 + $0x2c] ss:$16 sps:$4 sm:$0xff]  }
 0xbcb   : > { %v3617_v16 = vld [vmem:[%s4576_s27 + $0x20] ss:$16 sps:$4 sm:$0xff]   ;;  %v3618_v17 = vld [vmem:[%s4576_s27 + $0x28] ss:$16 sps:$4 sm:$0xff]   ;;  %v3619_v18 = vld [vmem:[%s4576_s27 + $0x4] ss:$16 sps:$4 sm:$0xff]  }
 0xbcc   : > { %v3621_v19 = vld [vmem:[%s4576_s27 + $0xc] ss:$16 sps:$4 sm:$0xff]   ;;  %v3623_v20 = vld [vmem:[%s4576_s27] ss:$16 sps:$4 sm:$0xff]   ;;  %v3624_v21 = vld [vmem:[%s4576_s27 + $0x8] ss:$16 sps:$4 sm:$0xff]  }
 0xbcd   : > { %2161 = vmatpush1.bf16.msra.mxu0 %v3593_v62  ;;  %2202 = vmatpush1.bf16.msra.mxu1 %v3594_v63  ;;  %v1941_v3 = vld [vmem:[#allocation2] sm:$0xf]  ;;  %v3625_v22 = vld [vmem:[%s4596_s24 + $0x78] sm:$0xff]   ;;  %v3629_v27 = vld [vmem:[%s4596_s24 + $0x70] sm:$0xff]   ;;  %s5115_s27 = sld [smem:[#allocation35_spill]]  ;;  %v1932_v55 = vand.u32 127, %v1931_v54 }
 0xbce   : > { %2162 = vmatprep.subr.bf16.mxu0 %v3595_v0  ;;  %2203 = vmatprep.subr.bf16.mxu1 %v3597_v1  ;;  %v3626_v24 = vld [vmem:[%s4596_s24 + $0xf8] sm:$0xff]   ;;  %v3630_v28 = vld [vmem:[%s4596_s24 + $0xf0] sm:$0xff]   ;;  %v3633_v31 = vld [vmem:[%s4596_s24 + $0x68] sm:$0xff]   ;;  %v1977_v59 = vshrl.u32 %v1931_v54, 7  ;;  %s5118_s4 = sld [smem:[#allocation43_spill]]  ;;  %s2631_s28 = sshll.u32 %s4599_s3, 4  ;;  %s2632_s28 = int_to_ptr.vmem [resolvable:$true] %s2631_s28 }
 0xbcf   : > { %v3627_v25 = vld [vmem:[%s4596_s24 + $0x38] sm:$0xff]   ;;  %v3631_v29 = vld [vmem:[%s4596_s24 + $0x30] sm:$0xff]   ;;  %v3634_v23 = vld [vmem:[%s4596_s24 + $0xe8] sm:$0xff]   ;;  %s5119_s25 = sld [smem:[#allocation56_spill]]  ;;  %s5120_s1 = sand.u32 1, %s4111_s0  }
 0xbd0   : > { %v3628_v26 = vld [vmem:[%s4596_s24 + $0xb8] sm:$0xff]   ;;  %v3632_v30 = vld [vmem:[%s4596_s24 + $0xb0] sm:$0xff]   ;;  %v3635_v32 = vld [vmem:[%s4596_s24 + $0x28] sm:$0xff]   ;;  %v1978_v60 = vsub.s32 0, %v1977_v59  ;;  %v1986_v61 = vsub.s32 2, %v1977_v59  ;;  %v1982_v63 = vsub.s32 1, %v1977_v59 }
 0xbd1   : > { %2163 = vmatpush1.bf16.msra.mxu0 %v3599_v2  ;;  %2204 = vmatpush1.bf16.msra.mxu1 %v3600_v5  ;;  %v3636_v33 = vld [vmem:[%s4596_s24 + $0xa8] sm:$0xff]   ;;  %v3637_v34 = vld [vmem:[%s4596_s24 + $0x60] sm:$0xff]   ;;  %v3641_v38 = vld [vmem:[%s4596_s24 + $0x58] sm:$0xff]   ;;  %v1990_v0 = vsub.s32 3, %v1977_v59  ;;  %s2618_s30 = scalar_lea.sflag [#allocation6], %s5120_s1  ;;  %s3991_s6 = scalar_lea.vmem %s2632_s28, 128 }
 0xbd2   : > { %2164 = vmatprep.subr.bf16.mxu0 %v3601_v6  ;;  %2205 = vmatprep.subr.bf16.mxu1 %v3603_v7  ;;  %v3638_v35 = vld [vmem:[%s4596_s24 + $0xe0] sm:$0xff]   ;;  %v3642_v39 = vld [vmem:[%s4596_s24 + $0xd8] sm:$0xff]   ;;  %v3645_v42 = vld [vmem:[%s4596_s24 + $0x50] sm:$0xff]   ;;  %p3992_p11 = scmp.ne.s32.totalorder %s2632_s28, %s3991_s6 }
 0xbd3   : > { %v3639_v36 = vld [vmem:[%s4596_s24 + $0x20] sm:$0xff]   ;;  %v3643_v40 = vld [vmem:[%s4596_s24 + $0x18] sm:$0xff]   ;;  %v3646_v43 = vld [vmem:[%s4596_s24 + $0xd0] sm:$0xff]   ;;  %v1933_v56 = vstv %s5115_s27  ;;  %s4165_s27 = smov [#allocation23]  }
 0xbd4   : > { %v3640_v37 = vld [vmem:[%s4596_s24 + $0xa0] sm:$0xff]   ;;  %v3644_v41 = vld [vmem:[%s4596_s24 + $0x98] sm:$0xff]   ;;  %v3647_v44 = vld [vmem:[%s4596_s24 + $0x10] sm:$0xff]   ;;  %vm1934_vm1 = vcmp.eq.s32.totalorder %v1932_v55, %v1933_v56  ;;  %p5121_p1 = scmp.ne.s32.totalorder %s5118_s4, 0 }
 0xbd5   : > { %2165 = vmatpush1.bf16.msra.mxu0 %v3605_v8  ;;  %2206 = vmatpush1.bf16.msra.mxu1 %v3606_v9  ;;  %v3648_v45 = vld [vmem:[%s4596_s24 + $0x90] sm:$0xff]   ;;  %v3649_v46 = vld [vmem:[%s4596_s24 + $0x48] sm:$0xff]   ;;  %v3653_v51 = vld [vmem:[%s4596_s24 + $0x40] sm:$0xff]  }
 0xbd6   : > { %2166 = vmatprep.subr.bf16.mxu0 %v3607_v10  ;;  %2207 = vmatprep.subr.bf16.mxu1 %v3609_v11  ;;  %v3650_v47 = vld [vmem:[%s4596_s24 + $0xc8] sm:$0xff]   ;;  %v3654_v52 = vld [vmem:[%s4596_s24 + $0xc0] sm:$0xff]   ;;  %p3993_p12 = pnand %p3992_p11, %p5121_p1 }
 0xbd7   : > { %v3651_v48 = vld [vmem:[%s4596_s24 + $0x8] sm:$0xff]   ;;  %v3655_v4 = vld [vmem:[%s4596_s24] sm:$0xff]  }
 0xbd8   : > { %v3652_v50 = vld [vmem:[%s4596_s24 + $0x88] sm:$0xff]   ;;  %v3656_v53 = vld [vmem:[%s4596_s24 + $0x80] sm:$0xff]   ;;  %p3994_p10 = pneg %p3993_p12  ;;  %s3995_s24 = sshll.u32 %s4165_s27, 4  ;;  %s3996_s24 = int_to_ptr.vmem [resolvable:$false] %s3995_s24 }
 0xbd9   : > { %2167 = vmatpush1.bf16.msra.mxu0 %v3611_v12  ;;  %2208 = vmatpush1.bf16.msra.mxu1 %v3612_v13  ;;  %v1935_v57 = vld [vmem:[#allocation3] sm:$0xff]  ;;  %v1974_v62 = vld [vmem:[%s4594_s18] sm:$0xf]  ;;  %s5116_s18 = sld [smem:[#allocation36_spill]]  ;;  %p3998_p9 = scmp.lt.s32.totalorder %s2632_s28, %s3996_s24 }
 0xbda   : > { %2168 = vmatprep.subr.bf16.mxu0 %v3613_v14  ;;  %2209 = vmatprep.subr.bf16.mxu1 %v3615_v15  ;;  %v1936_v58 = vsel %vm1934_vm1, %v1935_v57, 0.0  ;;  %v1979_v1 = vrot.slane %v1974_v62, %v1978_v60  ;;  %v1987_v2 = vrot.slane %v1974_v62, %v1986_v61  ;;  %v1983_v5 = vrot.slane %v1974_v62, %v1982_v63  ;;  %v2613_v56 = vld [vmem:[%s4599_s3] sm:$0xff] }
 0xbdb   : > { %v1938_v49 = vsel %vm1937_vm0, %v1936_v58, 0.0  ;;  %v1991_v6 = vrot.slane %v1974_v62, %v1990_v0 }
 0xbdc   : > { %1939 = vadd.xlane.f32.xlu0 %v1938_v49 }
 0xbdd   : > { %2169 = vmatpush1.bf16.msra.mxu0 %v3617_v16  ;;  %2210 = vmatpush1.bf16.msra.mxu1 %v3618_v17 }
 0xbde   : > { %2170 = vmatprep.subr.bf16.mxu0 %v3619_v18  ;;  %2211 = vmatprep.subr.bf16.mxu1 %v3621_v19 }
 0xbdf   : > { %s3016_s23 = sshll.u32 %s5116_s18, 7  ;;  %s3997_s18 = scalar_lea.vmem %s3996_s24, 256 }
 0xbe0   : > { %s2629_s19 = scalar_lea.hbm %s5119_s25, %s3016_s23  ;;  %p3999_p6 = scmp.lt.s32.totalorder %s3997_s18, %s3991_s6 }
 0xbe1   : > { %2171 = vmatpush1.bf16.msra.mxu0 %v3623_v20  ;;  %2212 = vmatpush1.bf16.msra.mxu1 %v3624_v21 }
 0xbe2   : > { %3090 = vmatprep.subr.bf16.mxu0 %v3625_v22  ;;  %3112 = vmatprep.subr.bf16.mxu1 %v3626_v24  ;;  %p4000_p4 = por %p3999_p6, %p3998_p9 }
 0xbe4   : > { %2189 = vmatmul.mubr.bf16.vlgmr.msra.gmra.mxu0 %v1941_v3  ;;  %2230 = vmatmul.mubr.bf16.vlgmr.msra.gmra.mxu1 %v1941_v3  ;;  %p4001_p7 = pnand %p4000_p4, %p3994_p10 }
 0xbe5   : > { %3091 = vmatpush3.bf16.msra.mxu0 %v3627_v25  ;;  %3113 = vmatpush3.bf16.msra.mxu1 %v3628_v26 }
 0xbe6   : > { %3092 = vmatprep.subr.bf16.mxu0 %v3629_v27  ;;  %3114 = vmatprep.subr.bf16.mxu1 %v3630_v28 }
 0xbe9   : > { %3093 = vmatpush3.bf16.msra.mxu0 %v3631_v29  ;;  %3115 = vmatpush3.bf16.msra.mxu1 %v3632_v30 }
 0xbea   : > { %3094 = vmatprep.subr.bf16.mxu0 %v3633_v31  ;;  %3116 = vmatprep.subr.bf16.mxu1 %v3634_v23 }
 0xbed   : > { %3095 = vmatpush3.bf16.msra.mxu0 %v3635_v32  ;;  %3117 = vmatpush3.bf16.msra.mxu1 %v3636_v33 }
 0xbee   : > { %3096 = vmatprep.subr.bf16.mxu0 %v3637_v34  ;;  %3118 = vmatprep.subr.bf16.mxu1 %v3638_v35 }
 0xbf1   : > { %3097 = vmatpush3.bf16.msra.mxu0 %v3639_v36  ;;  %3119 = vmatpush3.bf16.msra.mxu1 %v3640_v37 }
 0xbf2   : > { %3098 = vmatprep.subr.bf16.mxu0 %v3641_v38  ;;  %3120 = vmatprep.subr.bf16.mxu1 %v3642_v39 }
 0xbf5   : > { %3099 = vmatpush3.bf16.msra.mxu0 %v3643_v40  ;;  %3121 = vmatpush3.bf16.msra.mxu1 %v3644_v41 }
 0xbf6   : > { %3100 = vmatprep.subr.bf16.mxu0 %v3645_v42  ;;  %3122 = vmatprep.subr.bf16.mxu1 %v3646_v43 }
 0xbf9   : > { %3101 = vmatpush3.bf16.msra.mxu0 %v3647_v44  ;;  %3123 = vmatpush3.bf16.msra.mxu1 %v3648_v45  ;;  %v2982_v44 = vld [vmem:[%s824_s7] ss:$0 sm:$0xff] }
 0xbfa   : > { %3102 = vmatprep.subr.bf16.mxu0 %v3649_v46  ;;  %3124 = vmatprep.subr.bf16.mxu1 %v3650_v47 }
 0xbfd   : > { %3103 = vmatpush3.bf16.msra.mxu0 %v3651_v48  ;;  %3125 = vmatpush3.bf16.msra.mxu1 %v3652_v50 }
 0xbfe   : > { %3104 = vmatprep.subr.bf16.mxu0 %v3653_v51  ;;  %3126 = vmatprep.subr.bf16.mxu1 %v3654_v52 }
 0xc01   : > { %3105 = vmatpush3.bf16.msra.mxu0 %v3655_v4  ;;  %3127 = vmatpush3.bf16.msra.mxu1 %v3656_v53 }
 0xc65   : > { %v1940_v53 = vpop.xlane.xlu0 %1939 }
 0xca4   : > { %v2190_v7 = vpop.f32.mrf.mxu0  ;;  %v2231_v8 = vpop.f32.mrf.mxu1 }
 0xca5   : > { %v2191_v9 = vadd.f32 %v2190_v7, %v1979_v1  ;;  %v2232_v10 = vadd.f32 %v2231_v8, %v1987_v2 }
 0xca6   : > { %v2192_v11 = vpop.f32.mrf.mxu0  ;;  %v2233_v12 = vpop.f32.mrf.mxu1 }
 0xca7   : > { %v2978_v13 = vmul.f32 -1.442695, %v2191_v9  ;;  %v2980_v14 = vmul.f32 -1.442695, %v2232_v10  ;;  %v2193_v15 = vadd.f32 %v2192_v11, %v1983_v5  ;;  %v2234_v16 = vadd.f32 %v2233_v12, %v1991_v6 }
 0xca8   : > { %v2194_v17 = vpop.f32.mrf.mxu0  ;;  %v2235_v18 = vpop.f32.mrf.mxu1 }
 0xca9   : > { %3657 = vpow2.f32 %v2978_v13  ;;  %v2979_v19 = vmul.f32 -1.442695, %v2193_v15  ;;  %v2981_v20 = vmul.f32 -1.442695, %v2234_v16 }
 0xcaa   : > { %3659 = vpow2.f32 %v2980_v14  ;;  %v2195_v21 = vpop.f32.mrf.mxu0  ;;  %v2236_v3 = vpop.f32.mrf.mxu1 }
 0xcab   : > { %3661 = vpow2.f32 %v2979_v19 }
 0xcac   : > { %3663 = vpow2.f32 %v2981_v20 }
 0xcb6   : > { %v3658_v22 = vpop.eup %3657 }
 0xcb7   : > { %v3660_v24 = vpop.eup %3659  ;;  %v2250_v25 = vadd.f32 1.0, %v3658_v22 }
 0xcb8   : > { %v3662_v26 = vpop.eup %3661  ;;  %v2252_v27 = vadd.f32 1.0, %v3660_v24 }
 0xcb9   : > { %v3664_v28 = vpop.eup %3663  ;;  %3665 = vrcp.f32 %v2250_v25  ;;  %v2251_v29 = vadd.f32 1.0, %v3662_v26 }
 0xcba   : > { %3667 = vrcp.f32 %v2252_v27  ;;  %v2253_v30 = vadd.f32 1.0, %v3664_v28 }
 0xcbb   : > { %3669 = vrcp.f32 %v2251_v29 }
 0xcbc   : > { %3671 = vrcp.f32 %v2253_v30 }
 0xcc6   : > { %v3666_v31 = vpop.eup %3665 }
 0xcc7   : > { %v3668_v23 = vpop.eup %3667  ;;  %v2262_v33 = vmul.f32 %v3666_v31, %v2191_v9 }
 0xcc8   : > { %v3670_v32 = vpop.eup %3669  ;;  %v2264_v35 = vmul.f32 %v3668_v23, %v2232_v10 }
 0xcc9   : > { %v3672_v34 = vpop.eup %3671  ;;  %v2263_v36 = vmul.f32 %v3670_v32, %v2193_v15  ;;  %v2266_v39 = vpack.c.bf16 %v2262_v33, %v2262_v33 }
 0xcca   : > { %v2265_v37 = vmul.f32 %v3672_v34, %v2234_v16  ;;  %v2268_v41 = vpack.c.bf16 %v2264_v35, %v2264_v35 }
 0xccb   : > { %v2267_v38 = vpack.c.bf16 %v2263_v36, %v2263_v36 }
 0xccc   : > { %v2269_v40 = vpack.c.bf16 %v2265_v37, %v2265_v37 }
 0xccd   : > { %2565 = vmatprep.mubr.bf16.mxu0 %v2267_v38 }
 0xcce   : > { %2605 = vmatprep.mubr.bf16.mxu1 %v2269_v40  ;;  %2566 = vmatmul.mubr.bf16.vlgmr.msra.gmra.mxu0 %v2266_v39 }
 0xccf   : > { %2606 = vmatmul.mubr.bf16.vlgmr.msra.gmra.mxu1 %v2268_v41 }
 0xd8e   : > { %v3106_v42 = vpop.f32.mrf.mxu0 }
 0xd8f   : > { %v3128_v43 = vpop.f32.mrf.mxu1 }
 0xd90   : > { %v3107_v45 = vpop.f32.mrf.mxu0 }
 0xd91   : > { %v3108_v46 = vadd.f32 %v3107_v45, %v3106_v42  ;;  %v3129_v47 = vpop.f32.mrf.mxu1 }
 0xd92   : > { %v3109_v48 = vpop.f32.mrf.mxu0  ;;  %v3130_v51 = vadd.f32 %v3129_v47, %v3128_v43 }
 0xd93   : > { %v2568_v50 = vadd.f32 %v3108_v46, %v2982_v44  ;;  %v3131_v52 = vpop.f32.mrf.mxu1 }
 0xd94   : > { %v3110_v4 = vpop.f32.mrf.mxu0 }
 0xd95   : > { %v3132_v54 = vpop.f32.mrf.mxu1  ;;  %v2608_v55 = vadd.f32 %v3130_v51, %v2568_v50 }
 0xd97   : > { %v2614_v57 = vmul.f32 %v2608_v55, %v1940_v53 }
 0xd99   : > { %v2615_v58 = vadd.f32 %v2614_v57, %v2613_v56 }
 0xd9b   : > { %2616 = vst [vmem:[%s4599_s3] sm:$0xff] %v2615_v58 }
 0xd9c   : > { %4004 = shalt.err (!%p4001_p7)
}
 0xd9d   : > { %s4005_s12 = scalar_lea.hbm %s2629_s19, 128  ;;  %s4009_s23 = scalar_lea.hbm %s5119_s25, 256 }
 0xd9e   : > { %p4006_p13 = scmp.ne.s32.totalorder %s2629_s19, %s4005_s12  ;;  %p4010_p8 = scmp.lt.s32.totalorder %s2629_s19, %s5119_s25 }
 0xd9f   : > { %p4011_p3 = scmp.lt.s32.totalorder %s4009_s23, %s4005_s12 }
 0xda0   : > { %p4007_p5 = pnand %p4006_p13, %p5121_p1 }
 0xda1   : > { %p4012_p2 = por %p4011_p3, %p4010_p8 }
 0xda2   : > { %p4008_p0 = pneg %p4007_p5 }
 0xda4   : > { %p4013_p11 = pnand %p4012_p2, %p4008_p0 }
 0xda6   : > { %4016 = shalt.err (!%p4013_p11)
}
 0xda7   : > { %3339 = dma.vmem_to_hbm [thread:$0]  (%p5121_p1), %s2632_s28, 128, %s2629_s19, %s2618_s30  }
 0xda8 PF: > { %s5122_s1 = sld [smem:[#allocation33_spill]]  ;;  %p3402_p12 = scmp.ge.s32.totalorder %s4135_s2, 2 }
 0xda9   : > { %s5123_s6 = sld [smem:[#allocation44_spill]] }
 0xdae   : > { %s2643_s27 = sand.u32 1, %s5122_s1  }
 0xdaf   : > { %p5124_p10 = scmp.ne.s32.totalorder %s5123_s6, 0  ;;  %s2644_s24 = scalar_lea.sflag [#allocation6], %s2643_s27 }
 0xdb1   : > { %p3380_p9 = pnand %p3402_p12, %p5124_p10 }
 0xdb3   : > { %p3381_p6 = pneg %p3380_p9 }
 0xdb5   : > { %4090 = dma.done.wait (%p3381_p6), %s2644_s24, 128  }
 0xdb6   : > { %4092 = vsyncadd (%p3381_p6), %s2644_s24, 4294967168  ;;  %s39_s2 = sadd.s32 1, %s4135_s2   ;;  %s5125_s27 = sld [smem:[#allocation32_spill]] }
 0xdb7   : > { %p36_p4 = scmp.ge.s32.totalorder %s39_s2, 10   ;;  %s5126_s18 = sld [smem:[#allocation40_spill]] }
 0xdb8   : > { %s5127_s4 = sld [smem:[#allocation34_spill]]  ;;  %s5131_s28 = smov %s4103_s29 }
 0xdb9   : > { %s5128_s19 = sld [smem:[#allocation41_spill]]  ;;  %s5133_s30 = smov %s4111_s0 }
 0xdba   : > { %s5129_s12 = sld [smem:[#allocation37_spill]]  ;;  %s5135_s1 = smov %s4127_s21 }
 0xdbb   : > { %s5130_s3 = sld [smem:[#allocation38_spill]]  ;;  %s5136_s20 = smov %s4131_s22 }
 0xdbd   : > { %s5132_s29 = smov %s5126_s18  ;;  %38 = sbr.rel (!%p36_p4) target bundleno = 27 (0x1b), region = 205 }
 0xdbe   : > { %s5134_s0 = smov %s5127_s4 }
 0xdc0   : > { %s5137_s21 = smov %s5129_s12 }
 0xdc1   : > { %s5138_s22 = smov %s5130_s3 }
 0xdc2   :  { %2649 = vsyncpa [#allocation5], 1 }
 0xdc3   :  { %2651 = vsyncpa [#allocation5 + $0x1], 1 }
 0xdc4   :  { %2652 = vsyncpa [#allocation8], 1 }
 0xdc5   :  { %2653 = vsyncpa [#allocation11], 1 }
 0xdc6   :  { %2654 = vsyncpa [#allocation14], 1 }
 0xdc7   :  { %2655 = vsyncpa [#allocation17], 1 }
 0xdc8   :  { %2656 = vsyncpa [#allocation20], 1 }
 0xdc9   :  { %2657 = vsyncpa [#allocation6], 1 }
 0xdca   :  { %2659 = vsyncpa [#allocation6 + $0x1], 1 }

</bundles_post_ra>
